<compile_context>
chip_gen: v5e
topology: v5e:2x2
jax: 0.10.0
libtpu: 0.0.40
codegen_flags: <defaults>
</compile_context>

<pallas_src>
import jax
import jax.numpy as jnp
from jax.experimental import pallas as pl
from jax.experimental.pallas import tpu as pltpu


# ----------------------------------------------------------------------------- kernel
def list_kernel(xy_ref, f1_ref,
                wlin_ref, blin_ref,
                wg_ref, bg_ref,
                wm_ref, bm_ref,
                wse1_ref, wse2_ref,
                out_ref):
    c2 = wse2_ref.shape[0]          # channels (= 2C)
    s = xy_ref.shape[0] // c2       # spatial positions (= 25)
    tb = xy_ref.shape[1]            # batch tile in lanes

    xy = xy_ref[...]                                                  # (S*2C, TB)

    # linear_x / linear_y for all channels at once (block-diagonal weight),
    # rows ordered (spatial t, channel k):  xlyl[(t,k), b] = (xl|yl)[b, k, t]
    xlyl = jnp.dot(wlin_ref[...], xy,
                   preferred_element_type=jnp.float32) + blin_ref[...]

    # fc_x + fc_y merged into one contraction over the 2C channel index.
    g = jnp.dot(wg_ref[...], xlyl,
                preferred_element_type=jnp.float32) + bg_ref[...]     # (S*C, TB)

    # fc_xy + sigmoid  ->  gating mask M, same (spatial, channel) row order.
    m = jax.nn.sigmoid(
        jnp.dot(wm_ref[...], g,
                preferred_element_type=jnp.float32) + bm_ref[...])    # (S*2C, TB)

    # hsi/lidar * M and the concat collapse to a single elementwise product.
    hl = xlyl * m                                                     # (S*2C, TB)

    # softmax over the spatial axis.  The reshape is layout-free because the
    # channel count (8) equals the native sublane tile.
    hl3 = hl.reshape(s, c2, tb)                                       # (S, 2C, TB)
    mx = jnp.max(hl3, axis=0)                                         # (2C, TB)
    ez = jnp.exp(hl3 - mx[None, :, :])
    inv = pl.reciprocal(jnp.sum(ez, axis=0), approx=True)             # EUP reciprocal
    rate = ez * inv[None, :, :]                                       # (S, 2C, TB)

    # SELayer on f1 (global average pool over the 5x5 spatial positions),
    # batched across the whole tile.
    f3 = f1_ref[...].reshape(s, c2, tb)                               # (S, 2C, TB)
    pooled = jnp.mean(f3, axis=0)                                     # (2C, TB)
    h1 = jnp.maximum(
        jnp.dot(wse1_ref[...], pooled, preferred_element_type=jnp.float32), 0.0)
    gate = jax.nn.sigmoid(
        jnp.dot(wse2_ref[...], h1, preferred_element_type=jnp.float32))  # (2C, TB)

    out_ref[...] = ((f3 * gate[None, :, :]) * rate).reshape(s * c2, tb)


# ---------------------------------------------------------------------------- wrapper
def list_forward(x, y, f1, p, *, tile_b=128):
    """LiST forward (arg=3, drop=-1).  x, y: (B, C, 25); f1: (B, 2C, 25)."""
    B, C, S = x.shape
    C2 = f1.shape[1]
    f32 = jnp.float32
    assert tile_b % 128 == 0, "batch tile must be lane-dense (multiple of 128)"

    # ---- layout plumbing (XLA side): batch -> lanes, rows ordered (spatial, channel)
    xy = jnp.concatenate([x, y], axis=1)                              # (B, 2C, S)
    xy2 = jnp.transpose(xy, (2, 1, 0)).reshape(S * C2, B)             # (S*2C, B)
    f2 = jnp.transpose(f1, (2, 1, 0)).reshape(S * C2, B)

    n_tiles = pl.cdiv(B, tile_b)
    Bp = n_tiles * tile_b
    if Bp != B:
        xy2 = jnp.pad(xy2, ((0, 0), (0, Bp - B)))
        f2 = jnp.pad(f2, ((0, 0), (0, Bp - B)))

    # ---- fold the small per-axis Linear weights into block-structured matrices
    # (in a real model these would be precomputed once, outside the step function).
    eye_s = jnp.eye(S, dtype=f32)
    sel_x = (jnp.arange(C2) < C).astype(f32)          # x-half of the channel index
    sel_y = 1.0 - sel_x
    w_lin = (jnp.kron(p["wlx"].astype(f32), jnp.diag(sel_x))
             + jnp.kron(p["wly"].astype(f32), jnp.diag(sel_y)))       # (S*2C, S*2C)
    b_lin = (jnp.kron(p["blx"], sel_x)
             + jnp.kron(p["bly"], sel_y)).reshape(-1, 1)              # (S*2C, 1)
    w_g = jnp.kron(eye_s, jnp.concatenate([p["wfx"], p["wfy"]], axis=1))  # (S*C, S*2C)
    b_g = jnp.kron(jnp.ones((S,), f32), p["bfx"] + p["bfy"]).reshape(-1, 1)
    w_m = jnp.kron(eye_s, p["wfxy"])                                  # (S*2C, S*C)
    b_m = jnp.kron(jnp.ones((S,), f32), p["bfxy"]).reshape(-1, 1)

    rep = lambda shape: pl.BlockSpec(shape, lambda i: (0, 0))         # weight (resident)

    out2 = pl.pallas_call(
        list_kernel,
        out_shape=jax.ShapeDtypeStruct((S * C2, Bp), f32),
        grid=(n_tiles,),
        in_specs=[
            pl.BlockSpec((S * C2, tile_b), lambda i: (0, i)),   # xy2 (data)
            pl.BlockSpec((S * C2, tile_b), lambda i: (0, i)),   # f2  (data)
            rep((S * C2, S * C2)),   # w_lin
            rep((S * C2, 1)),        # b_lin
            rep((S * C, S * C2)),    # w_g
            rep((S * C, 1)),         # b_g
            rep((S * C2, S * C)),    # w_m
            rep((S * C2, 1)),        # b_m
            rep((C, C2)),            # wse1
            rep((C2, C)),            # wse2
        ],
        out_specs=pl.BlockSpec((S * C2, tile_b), lambda i: (0, i)),
        compiler_params=pltpu.CompilerParams(
            dimension_semantics=("parallel",)),
    )(xy2, f2, w_lin, b_lin, w_g, b_g, w_m, b_m, p["wse1"], p["wse2"])

    # back to the PyTorch (B, 2C, S) layout
    return jnp.transpose(out2[:, :B].reshape(S, C2, B), (2, 1, 0))


# ---------------------------------------------------------------------------- reference
def list_ref(x, y, f1, p):
    """Pure-JAX reproduction of the PyTorch forward (arg=3, no dropout)."""
    C = x.shape[1]
    xl = jnp.einsum("bcs,ts->bct", x, p["wlx"]) + p["blx"]
    yl = jnp.einsum("bcs,ts->bct", y, p["wly"]) + p["bly"]
    xt = jnp.swapaxes(xl, 1, 2)   # (B, S, C)
    yt = jnp.swapaxes(yl, 1, 2)

    pooled = jnp.mean(f1, axis=-1)                                   # (B, 2C)
    h1 = jax.nn.relu(jnp.einsum("bk,ck->bc", pooled, p["wse1"]))     # (B, C)
    gate = jax.nn.sigmoid(jnp.einsum("bc,kc->bk", h1, p["wse2"]))    # (B, 2C)
    value = f1 * gate[:, :, None]

    G = (jnp.einsum("bsc,dc->bsd", xt, p["wfx"]) + p["bfx"]
         + jnp.einsum("bsc,dc->bsd", yt, p["wfy"]) + p["bfy"])
    M = jax.nn.sigmoid(jnp.einsum("bsc,kc->bsk", G, p["wfxy"]) + p["bfxy"])
    hsi = xt * M[:, :, :C]
    lidar = yt * M[:, :, C:]
    hsi_lidar = jnp.swapaxes(jnp.concatenate([hsi, lidar], axis=-1), 1, 2)
    channel_rate = jax.nn.softmax(hsi_lidar, axis=-1)
    return value * channel_rate


# -------------------------------------------------------------------------------- main
if __name__ == "__main__":
    channels = 8          # LiST(channels=8) -> self.channel = 4
    C = channels // 2
    S = 25                # fixed by nn.Linear(25, 25) / 5x5 reshape
    B = 256               # batch tile of 128 samples per grid step -> grid=(2,)

    key = jax.random.PRNGKey(0)
    ks = jax.random.split(key, 15)
    f32 = jnp.float32

    x = jax.random.normal(ks[0], (B, C, S), dtype=f32)
    y = jax.random.normal(ks[1], (B, C, S), dtype=f32)
    f1 = jax.random.normal(ks[2], (B, channels, S), dtype=f32)

    # Deterministic synthetic parameters (PyTorch nn.Linear weight = (out, in)).
    p = {
        "wlx": 0.1 * jax.random.normal(ks[3], (S, S), dtype=f32),
        "blx": 0.1 * jax.random.normal(ks[4], (S,), dtype=f32),
        "wly": 0.1 * jax.random.normal(ks[5], (S, S), dtype=f32),
        "bly": 0.1 * jax.random.normal(ks[6], (S,), dtype=f32),
        "wfx": 0.1 * jax.random.normal(ks[7], (C, C), dtype=f32),
        "bfx": 0.1 * jax.random.normal(ks[8], (C,), dtype=f32),
        "wfy": 0.1 * jax.random.normal(ks[9], (C, C), dtype=f32),
        "bfy": 0.1 * jax.random.normal(ks[10], (C,), dtype=f32),
        "wfxy": 0.1 * jax.random.normal(ks[11], (channels, C), dtype=f32),
        "bfxy": 0.1 * jax.random.normal(ks[12], (channels,), dtype=f32),
        "wse1": 0.1 * jax.random.normal(ks[13], (C, channels), dtype=f32),  # SE fc1 (no bias)
        "wse2": 0.1 * jax.random.normal(ks[14], (channels, C), dtype=f32),  # SE fc2 (no bias)
    }

    fwd = jax.jit(lambda xx, yy, ff: list_forward(xx, yy, ff, p, tile_b=128))

    out = jax.block_until_ready(fwd(x, y, f1))
    ref = list_ref(x, y, f1, p)
    assert out.shape == (B, channels, S)
    # Tolerance allows for MXU f32 rounding and the EUP approximate reciprocal
    # used for the softmax denominator.
    assert jnp.allclose(out, ref, atol=1e-3, rtol=1e-2), \
        f"mismatch vs reference, max abs err = {float(jnp.max(jnp.abs(out - ref)))}"

    # Also exercise the batch-padding path (B not a multiple of the tile).
    out_s = jax.block_until_ready(list_forward(x[:3], y[:3], f1[:3], p, tile_b=128))
    ref_s = list_ref(x[:3], y[:3], f1[:3], p)
    assert out_s.shape == (3, channels, S)
    assert jnp.allclose(out_s, ref_s, atol=1e-3, rtol=1e-2), "mismatch on padded batch"

    print("KERNEL_OK")
</pallas_src>

<mosaic_0001>
module attributes {stable_mosaic.version = 11 : i64} {
  func.func @list_kernel(%arg0: i32, %arg1: memref<200x128xf32, #tpu.memory_space<vmem>>, %arg2: memref<200x128xf32, #tpu.memory_space<vmem>>, %arg3: memref<200x200xf32, #tpu.memory_space<vmem>>, %arg4: memref<200x1xf32, #tpu.memory_space<vmem>>, %arg5: memref<100x200xf32, #tpu.memory_space<vmem>>, %arg6: memref<100x1xf32, #tpu.memory_space<vmem>>, %arg7: memref<200x100xf32, #tpu.memory_space<vmem>>, %arg8: memref<200x1xf32, #tpu.memory_space<vmem>>, %arg9: memref<4x8xf32, #tpu.memory_space<vmem>>, %arg10: memref<8x4xf32, #tpu.memory_space<vmem>>, %arg11: memref<200x128xf32, #tpu.memory_space<vmem>>) attributes {dimension_semantics = [#tpu.dimension_semantics<parallel>], iteration_bounds = array<i64: 2>, scalar_prefetch = 0 : i64, scratch_operands = 0 : i64, tpu.core_type = #tpu.core_type<tc>, window_params = [{transform_indices = @transform_0, window_bounds = array<i64: 200, 128>}, {transform_indices = @transform_1, window_bounds = array<i64: 200, 128>}, {pipeline_mode = #tpu.pipeline_mode<synchronous>, transform_indices = @transform_2, window_bounds = array<i64: 200, 200>}, {pipeline_mode = #tpu.pipeline_mode<synchronous>, transform_indices = @transform_3, window_bounds = array<i64: 200, 1>}, {pipeline_mode = #tpu.pipeline_mode<synchronous>, transform_indices = @transform_4, window_bounds = array<i64: 100, 200>}, {pipeline_mode = #tpu.pipeline_mode<synchronous>, transform_indices = @transform_5, window_bounds = array<i64: 100, 1>}, {pipeline_mode = #tpu.pipeline_mode<synchronous>, transform_indices = @transform_6, window_bounds = array<i64: 200, 100>}, {pipeline_mode = #tpu.pipeline_mode<synchronous>, transform_indices = @transform_7, window_bounds = array<i64: 200, 1>}, {pipeline_mode = #tpu.pipeline_mode<synchronous>, transform_indices = @transform_8, window_bounds = array<i64: 4, 8>}, {pipeline_mode = #tpu.pipeline_mode<synchronous>, transform_indices = @transform_9, window_bounds = array<i64: 8, 4>}, {transform_indices = @transform_10, window_bounds = array<i64: 200, 128>}]} {
    %c0 = arith.constant 0 : index
    %c0_0 = arith.constant 0 : index
    %0 = vector.load %arg1[%c0, %c0_0] : memref<200x128xf32, #tpu.memory_space<vmem>>, vector<200x128xf32>
    %c0_1 = arith.constant 0 : index
    %c0_2 = arith.constant 0 : index
    %1 = vector.load %arg3[%c0_1, %c0_2] : memref<200x200xf32, #tpu.memory_space<vmem>>, vector<200x200xf32>
    %cst = arith.constant dense<0.000000e+00> : vector<200x128xf32>
    %2 = tpu.matmul %1, %0, %cst {dimension_numbers = #tpu.dot_dimension_numbers<[1], [0], [0], [1], [0, 0, 1, 1], [], []>} : vector<200x200xf32>, vector<200x128xf32>, vector<200x128xf32> -> vector<200x128xf32>
    %c0_3 = arith.constant 0 : index
    %c0_4 = arith.constant 0 : index
    %3 = vector.load %arg4[%c0_3, %c0_4] : memref<200x1xf32, #tpu.memory_space<vmem>>, vector<200x1xf32>
    %4 = vector.broadcast %3 : vector<200x1xf32> to vector<200x128xf32>
    %5 = arith.addf %2, %4 : vector<200x128xf32>
    %c0_5 = arith.constant 0 : index
    %c0_6 = arith.constant 0 : index
    %6 = vector.load %arg5[%c0_5, %c0_6] : memref<100x200xf32, #tpu.memory_space<vmem>>, vector<100x200xf32>
    %cst_7 = arith.constant dense<0.000000e+00> : vector<100x128xf32>
    %7 = tpu.matmul %6, %5, %cst_7 {dimension_numbers = #tpu.dot_dimension_numbers<[1], [0], [0], [1], [0, 0, 1, 1], [], []>} : vector<100x200xf32>, vector<200x128xf32>, vector<100x128xf32> -> vector<100x128xf32>
    %c0_8 = arith.constant 0 : index
    %c0_9 = arith.constant 0 : index
    %8 = vector.load %arg6[%c0_8, %c0_9] : memref<100x1xf32, #tpu.memory_space<vmem>>, vector<100x1xf32>
    %9 = vector.broadcast %8 : vector<100x1xf32> to vector<100x128xf32>
    %10 = arith.addf %7, %9 : vector<100x128xf32>
    %c0_10 = arith.constant 0 : index
    %c0_11 = arith.constant 0 : index
    %11 = vector.load %arg7[%c0_10, %c0_11] : memref<200x100xf32, #tpu.memory_space<vmem>>, vector<200x100xf32>
    %cst_12 = arith.constant dense<0.000000e+00> : vector<200x128xf32>
    %12 = tpu.matmul %11, %10, %cst_12 {dimension_numbers = #tpu.dot_dimension_numbers<[1], [0], [0], [1], [0, 0, 1, 1], [], []>} : vector<200x100xf32>, vector<100x128xf32>, vector<200x128xf32> -> vector<200x128xf32>
    %c0_13 = arith.constant 0 : index
    %c0_14 = arith.constant 0 : index
    %13 = vector.load %arg8[%c0_13, %c0_14] : memref<200x1xf32, #tpu.memory_space<vmem>>, vector<200x1xf32>
    %14 = vector.broadcast %13 : vector<200x1xf32> to vector<200x128xf32>
    %15 = arith.addf %12, %14 : vector<200x128xf32>
    %16 = arith.negf %15 : vector<200x128xf32>
    %17 = math.exp %16 : vector<200x128xf32>
    %cst_15 = arith.constant 1.000000e+00 : f32
    %18 = vector.broadcast %cst_15 : f32 to vector<200x128xf32>
    %19 = arith.addf %18, %17 : vector<200x128xf32>
    %20 = arith.divf %18, %19 : vector<200x128xf32>
    %21 = arith.mulf %5, %20 : vector<200x128xf32>
    %22 = vector.shape_cast %21 : vector<200x128xf32> to vector<25x8x128xf32>
    %cst_16 = arith.constant dense<0xFF800000> : vector<8x128xf32>
    %23 = vector.multi_reduction <maximumf>, %22, %cst_16 [0] : vector<25x8x128xf32> to vector<8x128xf32>
    %24 = vector.shape_cast %23 : vector<8x128xf32> to vector<1x8x128xf32>
    %25 = vector.broadcast %24 : vector<1x8x128xf32> to vector<25x8x128xf32>
    %26 = arith.subf %22, %25 : vector<25x8x128xf32>
    %27 = math.exp %26 : vector<25x8x128xf32>
    %cst_17 = arith.constant dense<0.000000e+00> : vector<8x128xf32>
    %28 = vector.multi_reduction <add>, %27, %cst_17 [0] : vector<25x8x128xf32> to vector<8x128xf32>
    %29 = tpu.reciprocal %28 {approx = true} : vector<8x128xf32> -> vector<8x128xf32>
    %30 = vector.shape_cast %29 : vector<8x128xf32> to vector<1x8x128xf32>
    %31 = vector.broadcast %30 : vector<1x8x128xf32> to vector<25x8x128xf32>
    %32 = arith.mulf %27, %31 : vector<25x8x128xf32>
    %c0_18 = arith.constant 0 : index
    %c0_19 = arith.constant 0 : index
    %33 = vector.load %arg2[%c0_18, %c0_19] : memref<200x128xf32, #tpu.memory_space<vmem>>, vector<200x128xf32>
    %34 = vector.shape_cast %33 : vector<200x128xf32> to vector<25x8x128xf32>
    %cst_20 = arith.constant dense<0.000000e+00> : vector<8x128xf32>
    %35 = vector.multi_reduction <add>, %34, %cst_20 [0] : vector<25x8x128xf32> to vector<8x128xf32>
    %cst_21 = arith.constant 2.500000e+01 : f32
    %36 = vector.broadcast %cst_21 : f32 to vector<8x128xf32>
    %37 = arith.divf %35, %36 : vector<8x128xf32>
    %c0_22 = arith.constant 0 : index
    %c0_23 = arith.constant 0 : index
    %38 = vector.load %arg9[%c0_22, %c0_23] : memref<4x8xf32, #tpu.memory_space<vmem>>, vector<4x8xf32>
    %cst_24 = arith.constant dense<0.000000e+00> : vector<4x128xf32>
    %39 = tpu.matmul %38, %37, %cst_24 {dimension_numbers = #tpu.dot_dimension_numbers<[1], [0], [0], [1], [0, 0, 1, 1], [], []>} : vector<4x8xf32>, vector<8x128xf32>, vector<4x128xf32> -> vector<4x128xf32>
    %cst_25 = arith.constant 0.000000e+00 : f32
    %40 = vector.broadcast %cst_25 : f32 to vector<4x128xf32>
    %41 = arith.maximumf %39, %40 : vector<4x128xf32>
    %c0_26 = arith.constant 0 : index
    %c0_27 = arith.constant 0 : index
    %42 = vector.load %arg10[%c0_26, %c0_27] : memref<8x4xf32, #tpu.memory_space<vmem>>, vector<8x4xf32>
    %cst_28 = arith.constant dense<0.000000e+00> : vector<8x128xf32>
    %43 = tpu.matmul %42, %41, %cst_28 {dimension_numbers = #tpu.dot_dimension_numbers<[1], [0], [0], [1], [0, 0, 1, 1], [], []>} : vector<8x4xf32>, vector<4x128xf32>, vector<8x128xf32> -> vector<8x128xf32>
    %44 = arith.negf %43 : vector<8x128xf32>
    %45 = math.exp %44 : vector<8x128xf32>
    %cst_29 = arith.constant 1.000000e+00 : f32
    %46 = vector.broadcast %cst_29 : f32 to vector<8x128xf32>
    %47 = arith.addf %46, %45 : vector<8x128xf32>
    %48 = arith.divf %46, %47 : vector<8x128xf32>
    %49 = vector.shape_cast %48 : vector<8x128xf32> to vector<1x8x128xf32>
    %50 = vector.broadcast %49 : vector<1x8x128xf32> to vector<25x8x128xf32>
    %51 = arith.mulf %34, %50 : vector<25x8x128xf32>
    %52 = arith.mulf %51, %32 : vector<25x8x128xf32>
    %53 = vector.shape_cast %52 : vector<25x8x128xf32> to vector<200x128xf32>
    %c0_30 = arith.constant 0 : index
    %c0_31 = arith.constant 0 : index
    %54 = vector.load %arg11[%c0_30, %c0_31] : memref<200x128xf32, #tpu.memory_space<vmem>>, vector<200x128xf32>
    tpu.vector_store %arg11[%c0_30, %c0_31], %53 {strides = array<i32>} : memref<200x128xf32, #tpu.memory_space<vmem>>, vector<200x128xf32>,
    return
  }
  func.func @transform_0(%arg0: i32) -> (i32, i32) {
    %c0_i32 = arith.constant 0 : i32
    %c0_i32_0 = arith.constant 0 : i32
    return %c0_i32, %arg0 : i32, i32
  }
  func.func @transform_1(%arg0: i32) -> (i32, i32) {
    %c0_i32 = arith.constant 0 : i32
    %c0_i32_0 = arith.constant 0 : i32
    return %c0_i32, %arg0 : i32, i32
  }
  func.func @transform_2(%arg0: i32) -> (i32, i32) {
    %c0_i32 = arith.constant 0 : i32
    %c0_i32_0 = arith.constant 0 : i32
    %c0_i32_1 = arith.constant 0 : i32
    return %c0_i32, %c0_i32_0 : i32, i32
  }
  func.func @transform_3(%arg0: i32) -> (i32, i32) {
    %c0_i32 = arith.constant 0 : i32
    %c0_i32_0 = arith.constant 0 : i32
    %c0_i32_1 = arith.constant 0 : i32
    return %c0_i32, %c0_i32_0 : i32, i32
  }
  func.func @transform_4(%arg0: i32) -> (i32, i32) {
    %c0_i32 = arith.constant 0 : i32
    %c0_i32_0 = arith.constant 0 : i32
    %c0_i32_1 = arith.constant 0 : i32
    return %c0_i32, %c0_i32_0 : i32, i32
  }
  func.func @transform_5(%arg0: i32) -> (i32, i32) {
    %c0_i32 = arith.constant 0 : i32
    %c0_i32_0 = arith.constant 0 : i32
    %c0_i32_1 = arith.constant 0 : i32
    return %c0_i32, %c0_i32_0 : i32, i32
  }
  func.func @transform_6(%arg0: i32) -> (i32, i32) {
    %c0_i32 = arith.constant 0 : i32
    %c0_i32_0 = arith.constant 0 : i32
    %c0_i32_1 = arith.constant 0 : i32
    return %c0_i32, %c0_i32_0 : i32, i32
  }
  func.func @transform_7(%arg0: i32) -> (i32, i32) {
    %c0_i32 = arith.constant 0 : i32
    %c0_i32_0 = arith.constant 0 : i32
    %c0_i32_1 = arith.constant 0 : i32
    return %c0_i32, %c0_i32_0 : i32, i32
  }
  func.func @transform_8(%arg0: i32) -> (i32, i32) {
    %c0_i32 = arith.constant 0 : i32
    %c0_i32_0 = arith.constant 0 : i32
    %c0_i32_1 = arith.constant 0 : i32
    return %c0_i32, %c0_i32_0 : i32, i32
  }
  func.func @transform_9(%arg0: i32) -> (i32, i32) {
    %c0_i32 = arith.constant 0 : i32
    %c0_i32_0 = arith.constant 0 : i32
    %c0_i32_1 = arith.constant 0 : i32
    return %c0_i32, %c0_i32_0 : i32, i32
  }
  func.func @transform_10(%arg0: i32) -> (i32, i32) {
    %c0_i32 = arith.constant 0 : i32
    %c0_i32_0 = arith.constant 0 : i32
    return %c0_i32, %arg0 : i32, i32
  }
}

</mosaic_0001>

<bundles_post_ra>
// kernel: _lambda_.1
= control target key start
LH: loop header
LB: loop body
LE: loop exit
PB: predicated region body
PF: predicated region fallthrough
CT: control target
= control target key end

     0   :  { %s4892_s0 = inlined_call_operand.vmem [shape: f32[200,256], index: 0, kind: input, shape index: {}]   ;;  %s4893_s1 = inlined_call_operand.vmem [shape: f32[200,256], index: 1, kind: input, shape index: {}]   ;;  %s4894_s2 = inlined_call_operand.vmem [shape: f32[200,200], index: 2, kind: input, shape index: {}]   ;;  %s4895_s3 = inlined_call_operand.vmem [shape: f32[200,1], index: 3, kind: input, shape index: {}]   ;;  %s4896_s4 = inlined_call_operand.vmem [shape: f32[100,200], index: 4, kind: input, shape index: {}]   ;;  %s4897_s5 = inlined_call_operand.vmem [shape: f32[100,1], index: 5, kind: input, shape index: {}]   ;;  %s4898_s6 = inlined_call_operand.vmem [shape: f32[200,100], index: 6, kind: input, shape index: {}]   ;;  %s4899_s7 = inlined_call_operand.vmem [shape: f32[200,1], index: 7, kind: input, shape index: {}]   ;;  %s4900_s8 = inlined_call_operand.vmem [shape: f32[4,8], index: 8, kind: input, shape index: {}]   ;;  %s4901_s9 = inlined_call_operand.vmem [shape: f32[8,4], index: 9, kind: input, shape index: {}]   ;;  %s4902_s10 = inlined_call_operand.hbm [shape: f32[200,256], index: 10, kind: output, shape index: {}]  }
   0x1   :  { %4905 = sst [smem:[#allocation7_spill]] %s4892_s0 }
   0x2   :  { %15 = vsyncpa [#allocation5], 0 }
   0x3   :  { %17 = vsyncpa [#allocation5 + $0x1], 0  ;;  %s3170_s13 = smov 0   ;;  %s3172_s14 = smov 0  }
   0x4   :  { %s3174_s15 = smov 0   ;;  %s3176_s16 = smov 0  }
   0x5 LB: > { %s4904_s17 = sadd.s32 4294967295, %s3108_s16   ;;  %s2682_s18 = sadd.s32 4294967294, %s3108_s16   ;;  %s3108_s16 = sphi %s3176_s16, %s4955_s16   ;;  %s3104_s15 = sphi %s3174_s15, %s4954_s15   ;;  %s3100_s14 = sphi %s3172_s14, %s4953_s14   ;;  %s3096_s13 = sphi %s3170_s13, %s4952_s13  }
   0x6   : > { %s3193_s19 = sadd.s32 1, %s3108_s16   ;;  %s30_s20 = sadd.s32 1, %s3104_s15 }
   0x7   : > { %s27_s21 = ssub.s32 %s3108_s16, %s3193_s19  ;;  %p37_p0 = scmp.ne.s32.totalorder %s3104_s15, %s3100_s14 }
   0x8   : > { %p28_p1 = scmp.eq.s32.totalorder %s27_s21, 0  ;;  %p38_p2 = scmp.eq.s32.totalorder %s3108_s16, 0 }
   0x9   : > { %p261_p3 = scmp.eq.s32.totalorder %s4904_s17, 1  ;;  %p266_p4 = scmp.ne.s32.totalorder %s3100_s14, %s3096_s13 }
   0xa   : > { %s3206_s22 = scalar_select %p28_p1, %s3104_s15, %s30_s20  }
   0xb   : > { %p3208_p5 = por %p38_p2, %p37_p0  ;;  %p3212_p6 = por %p261_p3, %p37_p0 }
   0xc   : > { %p267_p7 = scmp.eq.s32.totalorder %s2682_s18, 1  ;;  %p2684_p9 = scmp.ge.s32.totalorder %s3108_s16, 2 }
   0xe   : > { %p3216_p8 = por %p267_p7, %p266_p4  ;;  %307 = sbr.rel (%p2684_p9) target bundleno = 83 (0x53), region = 48 }
  0x13   : > { %310 = sbr.rel (!%p3208_p5) target bundleno = 54 (0x36), region = 52  ;;  %s312_s26 = sand.u32 (%p3208_p5), 1, %s3104_s15  }
  0x14   : > { %s2685_s27 = sshll.u32 (%p3208_p5), %s3108_s16, 3  ;;  %s2813_s28 = smul.u32 (%p3208_p5), 200, %s312_s26 }
  0x15   : > { %s4909_s0 = sld [smem:[#allocation7_spill]] (%p3208_p5) }
  0x16   : > { %s3235_s12 = scalar_lea.vmem (%p3208_p5), [#allocation2], %s2813_s28 }
  0x1b   : > { %s3230_s11 = scalar_lea.vmem %s4909_s0, %s2685_s27 }
  0x1c   : > { %v393_v0 = vld [vmem:[%s3230_s11] sm:$0xff]  ;;  %v395_v1 = vld [vmem:[%s3230_s11 + $0x10] sm:$0xff] }
  0x1d   : > { %v397_v2 = vld [vmem:[%s3230_s11 + $0x20] sm:$0xff]  ;;  %394 = vst [vmem:[%s3235_s12] sm:$0xff] %v393_v0  ;;  %v399_v3 = vld [vmem:[%s3230_s11 + $0x30] sm:$0xff] }
  0x1e   : > { %396 = vst [vmem:[%s3235_s12 + $0x8] sm:$0xff] %v395_v1  ;;  %v401_v4 = vld [vmem:[%s3230_s11 + $0x40] sm:$0xff]  ;;  %v403_v5 = vld [vmem:[%s3230_s11 + $0x50] sm:$0xff] }
  0x1f   : > { %398 = vst [vmem:[%s3235_s12 + $0x10] sm:$0xff] %v397_v2  ;;  %v405_v6 = vld [vmem:[%s3230_s11 + $0x60] sm:$0xff]  ;;  %v407_v7 = vld [vmem:[%s3230_s11 + $0x70] sm:$0xff] }
  0x20   : > { %400 = vst [vmem:[%s3235_s12 + $0x18] sm:$0xff] %v399_v3  ;;  %v409_v8 = vld [vmem:[%s3230_s11 + $0x80] sm:$0xff]  ;;  %v411_v9 = vld [vmem:[%s3230_s11 + $0x90] sm:$0xff] }
  0x21   : > { %402 = vst [vmem:[%s3235_s12 + $0x20] sm:$0xff] %v401_v4  ;;  %v413_v10 = vld [vmem:[%s3230_s11 + $0xa0] sm:$0xff]  ;;  %v415_v11 = vld [vmem:[%s3230_s11 + $0xb0] sm:$0xff] }
  0x22   : > { %404 = vst [vmem:[%s3235_s12 + $0x28] sm:$0xff] %v403_v5  ;;  %v417_v12 = vld [vmem:[%s3230_s11 + $0xc0] sm:$0xff]  ;;  %v419_v13 = vld [vmem:[%s3230_s11 + $0xd0] sm:$0xff] }
  0x23   : > { %406 = vst [vmem:[%s3235_s12 + $0x30] sm:$0xff] %v405_v6  ;;  %v421_v14 = vld [vmem:[%s3230_s11 + $0xe0] sm:$0xff]  ;;  %v423_v15 = vld [vmem:[%s3230_s11 + $0xf0] sm:$0xff] }
  0x24   : > { %408 = vst [vmem:[%s3235_s12 + $0x38] sm:$0xff] %v407_v7  ;;  %v425_v16 = vld [vmem:[%s3230_s11 + $0x100] sm:$0xff]  ;;  %v427_v17 = vld [vmem:[%s3230_s11 + $0x110] sm:$0xff] }
  0x25   : > { %410 = vst [vmem:[%s3235_s12 + $0x40] sm:$0xff] %v409_v8  ;;  %v429_v18 = vld [vmem:[%s3230_s11 + $0x120] sm:$0xff]  ;;  %v431_v19 = vld [vmem:[%s3230_s11 + $0x130] sm:$0xff] }
  0x26   : > { %412 = vst [vmem:[%s3235_s12 + $0x48] sm:$0xff] %v411_v9  ;;  %v433_v20 = vld [vmem:[%s3230_s11 + $0x140] sm:$0xff]  ;;  %v435_v21 = vld [vmem:[%s3230_s11 + $0x150] sm:$0xff] }
  0x27   : > { %414 = vst [vmem:[%s3235_s12 + $0x50] sm:$0xff] %v413_v10  ;;  %v437_v22 = vld [vmem:[%s3230_s11 + $0x160] sm:$0xff]  ;;  %v439_v23 = vld [vmem:[%s3230_s11 + $0x170] sm:$0xff] }
  0x28   : > { %416 = vst [vmem:[%s3235_s12 + $0x58] sm:$0xff] %v415_v11  ;;  %v441_v24 = vld [vmem:[%s3230_s11 + $0x180] sm:$0xff] }
  0x29   : > { %418 = vst [vmem:[%s3235_s12 + $0x60] sm:$0xff] %v417_v12 }
  0x2a   : > { %420 = vst [vmem:[%s3235_s12 + $0x68] sm:$0xff] %v419_v13 }
  0x2b   : > { %422 = vst [vmem:[%s3235_s12 + $0x70] sm:$0xff] %v421_v14 }
  0x2c   : > { %424 = vst [vmem:[%s3235_s12 + $0x78] sm:$0xff] %v423_v15 }
  0x2d   : > { %426 = vst [vmem:[%s3235_s12 + $0x80] sm:$0xff] %v425_v16 }
  0x2e   : > { %428 = vst [vmem:[%s3235_s12 + $0x88] sm:$0xff] %v427_v17 }
  0x2f   : > { %430 = vst [vmem:[%s3235_s12 + $0x90] sm:$0xff] %v429_v18 }
  0x30   : > { %432 = vst [vmem:[%s3235_s12 + $0x98] sm:$0xff] %v431_v19 }
  0x31   : > { %434 = vst [vmem:[%s3235_s12 + $0xa0] sm:$0xff] %v433_v20 }
  0x32   : > { %436 = vst [vmem:[%s3235_s12 + $0xa8] sm:$0xff] %v435_v21 }
  0x33   : > { %438 = vst [vmem:[%s3235_s12 + $0xb0] sm:$0xff] %v437_v22 }
  0x34   : > { %440 = vst [vmem:[%s3235_s12 + $0xb8] sm:$0xff] %v439_v23 }
  0x35   : > { %442 = vst [vmem:[%s3235_s12 + $0xc0] sm:$0xff] %v441_v24 }
  0x36 PF: > { %448 = sbr.rel (!%p3208_p5) target bundleno = 83 (0x53), region = 90  ;;  %s450_s18 = sand.u32 (%p3208_p5), 1, %s3104_s15  }
  0x37   : > { %s2686_s20 = sshll.u32 (%p3208_p5), %s3108_s16, 3  ;;  %s2814_s21 = smul.u32 (%p3208_p5), 200, %s450_s18 }
  0x38   : > { %s3291_s28 = scalar_lea.vmem (%p3208_p5), %s4893_s1, %s2686_s20 }
  0x39   : > { %v531_v25 = vld [vmem:[%s3291_s28] sm:$0xff] (%p3208_p5)  ;;  %v533_v26 = vld [vmem:[%s3291_s28 + $0x10] sm:$0xff] (%p3208_p5)  ;;  %s3296_s23 = scalar_lea.vmem (%p3208_p5), [#allocation3], %s2814_s21 }
  0x3a   : > { %v535_v27 = vld [vmem:[%s3291_s28 + $0x20] sm:$0xff] (%p3208_p5)  ;;  %532 = vst [vmem:[%s3296_s23] sm:$0xff] (%p3208_p5), %v531_v25  ;;  %v537_v28 = vld [vmem:[%s3291_s28 + $0x30] sm:$0xff] (%p3208_p5) }
  0x3b   : > { %534 = vst [vmem:[%s3296_s23 + $0x8] sm:$0xff] %v533_v26  ;;  %v539_v29 = vld [vmem:[%s3291_s28 + $0x40] sm:$0xff]  ;;  %v541_v30 = vld [vmem:[%s3291_s28 + $0x50] sm:$0xff] }
  0x3c   : > { %536 = vst [vmem:[%s3296_s23 + $0x10] sm:$0xff] %v535_v27  ;;  %v543_v31 = vld [vmem:[%s3291_s28 + $0x60] sm:$0xff]  ;;  %v545_v32 = vld [vmem:[%s3291_s28 + $0x70] sm:$0xff] }
  0x3d   : > { %538 = vst [vmem:[%s3296_s23 + $0x18] sm:$0xff] %v537_v28  ;;  %v547_v33 = vld [vmem:[%s3291_s28 + $0x80] sm:$0xff]  ;;  %v549_v34 = vld [vmem:[%s3291_s28 + $0x90] sm:$0xff] }
  0x3e   : > { %540 = vst [vmem:[%s3296_s23 + $0x20] sm:$0xff] %v539_v29  ;;  %v551_v35 = vld [vmem:[%s3291_s28 + $0xa0] sm:$0xff]  ;;  %v553_v36 = vld [vmem:[%s3291_s28 + $0xb0] sm:$0xff] }
  0x3f   : > { %542 = vst [vmem:[%s3296_s23 + $0x28] sm:$0xff] %v541_v30  ;;  %v555_v37 = vld [vmem:[%s3291_s28 + $0xc0] sm:$0xff]  ;;  %v557_v38 = vld [vmem:[%s3291_s28 + $0xd0] sm:$0xff] }
  0x40   : > { %544 = vst [vmem:[%s3296_s23 + $0x30] sm:$0xff] %v543_v31  ;;  %v559_v39 = vld [vmem:[%s3291_s28 + $0xe0] sm:$0xff]  ;;  %v561_v40 = vld [vmem:[%s3291_s28 + $0xf0] sm:$0xff] }
  0x41   : > { %546 = vst [vmem:[%s3296_s23 + $0x38] sm:$0xff] %v545_v32  ;;  %v563_v41 = vld [vmem:[%s3291_s28 + $0x100] sm:$0xff]  ;;  %v565_v42 = vld [vmem:[%s3291_s28 + $0x110] sm:$0xff] }
  0x42   : > { %548 = vst [vmem:[%s3296_s23 + $0x40] sm:$0xff] %v547_v33  ;;  %v567_v43 = vld [vmem:[%s3291_s28 + $0x120] sm:$0xff]  ;;  %v569_v44 = vld [vmem:[%s3291_s28 + $0x130] sm:$0xff] }
  0x43   : > { %550 = vst [vmem:[%s3296_s23 + $0x48] sm:$0xff] %v549_v34  ;;  %v571_v45 = vld [vmem:[%s3291_s28 + $0x140] sm:$0xff]  ;;  %v573_v46 = vld [vmem:[%s3291_s28 + $0x150] sm:$0xff] }
  0x44   : > { %552 = vst [vmem:[%s3296_s23 + $0x50] sm:$0xff] %v551_v35  ;;  %v575_v47 = vld [vmem:[%s3291_s28 + $0x160] sm:$0xff]  ;;  %v577_v48 = vld [vmem:[%s3291_s28 + $0x170] sm:$0xff] }
  0x45   : > { %554 = vst [vmem:[%s3296_s23 + $0x58] sm:$0xff] %v553_v36  ;;  %v579_v49 = vld [vmem:[%s3291_s28 + $0x180] sm:$0xff] }
  0x46   : > { %556 = vst [vmem:[%s3296_s23 + $0x60] sm:$0xff] %v555_v37 }
  0x47   : > { %558 = vst [vmem:[%s3296_s23 + $0x68] sm:$0xff] %v557_v38 }
  0x48   : > { %560 = vst [vmem:[%s3296_s23 + $0x70] sm:$0xff] %v559_v39 }
  0x49   : > { %562 = vst [vmem:[%s3296_s23 + $0x78] sm:$0xff] %v561_v40 }
  0x4a   : > { %564 = vst [vmem:[%s3296_s23 + $0x80] sm:$0xff] %v563_v41 }
  0x4b   : > { %566 = vst [vmem:[%s3296_s23 + $0x88] sm:$0xff] %v565_v42 }
  0x4c   : > { %568 = vst [vmem:[%s3296_s23 + $0x90] sm:$0xff] %v567_v43 }
  0x4d   : > { %570 = vst [vmem:[%s3296_s23 + $0x98] sm:$0xff] %v569_v44 }
  0x4e   : > { %572 = vst [vmem:[%s3296_s23 + $0xa0] sm:$0xff] %v571_v45 }
  0x4f   : > { %574 = vst [vmem:[%s3296_s23 + $0xa8] sm:$0xff] %v573_v46 }
  0x50   : > { %576 = vst [vmem:[%s3296_s23 + $0xb0] sm:$0xff] %v575_v47 }
  0x51   : > { %578 = vst [vmem:[%s3296_s23 + $0xb8] sm:$0xff] %v577_v48 }
  0x52   : > { %580 = vst [vmem:[%s3296_s23 + $0xc0] sm:$0xff] %v579_v49 }
  0x53 PF: > { %p2687_p10 = scmp.ge.s32.totalorder %s3108_s16, 1  ;;  %p585_p11 = scmp.lt.s32.totalorder %s3108_s16, 3 }
  0x55   : > { %p586_p12 = pnand %p2687_p10, %p585_p11 }
  0x56   : > { %s4903_s11 = sand.u32 (!%p586_p12), 1, %s3100_s14  }
  0x57   : > { %589 = sbr.rel (%p586_p12) target bundleno = 1143 (0x477), region = 128 }
  0x58   : > { %s3356_s20 = smul.u32 (!%p586_p12), 200, %s4903_s11  ;;  %s3066_s11 = scalar_lea.hbm (!%p586_p12), %s4902_s10, 400 }
  0x5a   : > { %s3362_s27 = scalar_lea.vmem (!%p586_p12), [#allocation2], %s3356_s20  ;;  %s4018_s26 = scalar_lea.vmem (!%p586_p12), [#allocation3], %s3356_s20 }
  0x5b   : > { %s4774_s28 = scalar_lea.vmem (!%p586_p12), [#allocation4], %s3356_s20  ;;  %s4950_s20 = sadd.s32 (!%p586_p12), 4294967295, %s3108_s16  }
  0x5c   : > { %v730_v50 = vld [vmem:[%s4895_s3 + $0x78] sm:$0xff]  ;;  %v728_v51 = vld [vmem:[%s4895_s3 + $0x68] sm:$0xff]  ;;  %v3110_v52 = vmov 0   ;;  %v729_v57 = vld [vmem:[%s4895_s3 + $0x70] sm:$0xff]  ;;  %vm865_vm0 = vcmask 588800   ;;  %vm1631_vm1 = vcmask 1043456  }
  0x5d   : > { %2860 = vset.pattern.permute.xlu0 %v3110_v52  ;;  %2861 = vset.pattern.permute.xlu1 %v3110_v52  ;;  %v726_v53 = vld [vmem:[%s4895_s3 + $0x58] sm:$0xff]  ;;  %v653_v56 = vld [vmem:[%s3362_s27 + $0x68] sm:$0xff]  ;;  %v727_v58 = vld [vmem:[%s4895_s3 + $0x60] sm:$0xff]  ;;  %vm1555_vm2 = vcmask 818176   ;;  %vm2434_vm4 = vcmask 64512   ;;  %s2781_s17 = sshll.u32 %s4950_s20, 3 }
  0x5e   : > { %817 = vperm.xlu0 %2860, %v730_v50   ;;  %807 = vperm.xlu1 %2861, %v728_v51   ;;  %v655_v54 = vld [vmem:[%s3362_s27 + $0x78] sm:$0xff]  ;;  %v654_v55 = vld [vmem:[%s3362_s27 + $0x70] sm:$0xff]  ;;  %v664_v59 = vld [vmem:[%s3362_s27 + $0xc0] sm:$0xff]  ;;  %s2592_s29 = scalar_lea.hbm %s4902_s10, %s2781_s17  ;;  %s2593_s30 = sshll.u32 %s4774_s28, 4  ;;  %s2594_s30 = int_to_ptr.vmem [resolvable:$true] %s2593_s30 }
  0x5f   : > { %2862 = vset.pattern.permute.xlu2 %v3110_v52  ;;  %941 = vmatpush.msra.mxu0 %v655_v54  ;;  %v652_v60 = vld [vmem:[%s3362_s27 + $0x60] sm:$0xff]  ;;  %v663_v61 = vld [vmem:[%s3362_s27 + $0xb8] sm:$0xff]  ;;  %v662_v0 = vld [vmem:[%s3362_s27 + $0xb0] sm:$0xff] }
  0x60   : > { %797 = vperm.xlu2 %2862, %v726_v53   ;;  %1040 = vmatpush.msra.mxu1 %v664_v59  ;;  %v739_v62 = vld [vmem:[%s4895_s3 + $0xc0] sm:$0xff]  ;;  %v650_v1 = vld [vmem:[%s3362_s27 + $0x50] sm:$0xff]  ;;  %v661_v2 = vld [vmem:[%s3362_s27 + $0xa8] sm:$0xff] }
  0x61   : > { %942 = vmatpush.msra.mxu0 %v654_v55  ;;  %v651_v63 = vld [vmem:[%s3362_s27 + $0x58] sm:$0xff]  ;;  %v649_v3 = vld [vmem:[%s3362_s27 + $0x48] sm:$0xff]  ;;  %v660_v4 = vld [vmem:[%s3362_s27 + $0xa0] sm:$0xff] }
  0x62   : > { %1041 = vmatpush.msra.mxu1 %v663_v61  ;;  %v725_v5 = vld [vmem:[%s4895_s3 + $0x50] sm:$0xff]  ;;  %v738_v6 = vld [vmem:[%s4895_s3 + $0xb8] sm:$0xff]  ;;  %v648_v7 = vld [vmem:[%s3362_s27 + $0x40] sm:$0xff] }
  0x63   : > { %943 = vmatpush.msra.mxu0 %v653_v56  ;;  %v659_v8 = vld [vmem:[%s3362_s27 + $0x98] sm:$0xff]  ;;  %v724_v9 = vld [vmem:[%s4895_s3 + $0x48] sm:$0xff]  ;;  %v658_v11 = vld [vmem:[%s3362_s27 + $0x90] sm:$0xff] }
  0x64   : > { %1042 = vmatpush.msra.mxu1 %v662_v0  ;;  %v647_v10 = vld [vmem:[%s3362_s27 + $0x38] sm:$0xff]  ;;  %v646_v12 = vld [vmem:[%s3362_s27 + $0x30] sm:$0xff]  ;;  %v657_v13 = vld [vmem:[%s3362_s27 + $0x88] sm:$0xff] }
  0x65   : > { %944 = vmatpush.msra.mxu0 %v652_v60  ;;  %v645_v14 = vld [vmem:[%s3362_s27 + $0x28] sm:$0xff]  ;;  %v656_v15 = vld [vmem:[%s3362_s27 + $0x80] sm:$0xff]  ;;  %v643_v21 = vld [vmem:[%s3362_s27 + $0x18] sm:$0xff] }
  0x66   : > { %812 = vperm.xlu0 %2860, %v729_v57   ;;  %802 = vperm.xlu1 %2861, %v727_v58   ;;  %v737_v16 = vld [vmem:[%s4895_s3 + $0xb0] sm:$0xff]  ;;  %v723_v17 = vld [vmem:[%s4895_s3 + $0x40] sm:$0xff]  ;;  %v666_v19 = vld [vmem:[%s4894_s2 + $0x8] sm:$0xff] }
  0x67   : > { %945 = vmatpush.msra.mxu0 %v651_v63  ;;  %1043 = vmatpush.msra.mxu1 %v661_v2  ;;  %v644_v18 = vld [vmem:[%s3362_s27 + $0x20] sm:$0xff]  ;;  %v642_v22 = vld [vmem:[%s3362_s27 + $0x10] sm:$0xff]  ;;  %v641_v23 = vld [vmem:[%s3362_s27 + $0x8] sm:$0xff] }
  0x68   : > { %862 = vperm.xlu2 %2862, %v739_v62   ;;  %v736_v20 = vld [vmem:[%s4895_s3 + $0xa8] sm:$0xff]  ;;  %v722_v24 = vld [vmem:[%s4895_s3 + $0x38] sm:$0xff]  ;;  %v735_v25 = vld [vmem:[%s4895_s3 + $0xa0] sm:$0xff] }
  0x69   : > { %946 = vmatpush.msra.mxu0 %v650_v1  ;;  %1044 = vmatpush.msra.mxu1 %v660_v4  ;;  %v640_v26 = vld [vmem:[%s3362_s27] sm:$0xff]  ;;  %v668_v27 = vld [vmem:[%s4894_s2 + $0x18] sm:$0xff]  ;;  %v721_v29 = vld [vmem:[%s4895_s3 + $0x30] sm:$0xff]  ;;  %s4851_s27 = sshll.u32 %s2592_s29, 4  ;;  %s2596_s27 = int_to_ptr.hbm [resolvable:$true] %s4851_s27 }
  0x6a   : > { %v665_v28 = vld [vmem:[%s4894_s2] sm:$0xff]  ;;  %v734_v30 = vld [vmem:[%s4895_s3 + $0x98] sm:$0xff]  ;;  %v720_v31 = vld [vmem:[%s4895_s3 + $0x28] sm:$0xff]  ;;  %s3060_s18 = sshra.s32 %s2596_s27, 4  ;;  %s3061_s18 = int_to_ptr.hbm [resolvable:$true] %s3060_s18 }
  0x6b   : > { %947 = vmatpush.msra.mxu0 %v649_v3  ;;  %1045 = vmatpush.msra.mxu1 %v659_v8  ;;  %v670_v32 = vld [vmem:[%s4894_s2 + $0x28] sm:$0xff]  ;;  %v667_v33 = vld [vmem:[%s4894_s2 + $0x10] sm:$0xff]  ;;  %v719_v35 = vld [vmem:[%s4895_s3 + $0x20] sm:$0xff]  ;;  %s3062_s21 = scalar_lea.hbm %s3061_s18, 200  ;;  %p3067_p2 = scmp.lt.s32.totalorder %s3061_s18, %s4902_s10 }
  0x6c   : > { %v733_v34 = vld [vmem:[%s4895_s3 + $0x90] sm:$0xff]  ;;  %v732_v36 = vld [vmem:[%s4895_s3 + $0x88] sm:$0xff]  ;;  %v672_v37 = vld [vmem:[%s4894_s2 + $0x38] sm:$0xff]  ;;  %p3063_p13 = scmp.ne.s32.totalorder %s3061_s18, %s3062_s21  ;;  %p3068_p3 = scmp.lt.s32.totalorder %s3066_s11, %s3062_s21 }
  0x6d   : > { %948 = vmatpush.msra.mxu0 %v648_v7  ;;  %1046 = vmatpush.msra.mxu1 %v658_v11  ;;  %v669_v38 = vld [vmem:[%s4894_s2 + $0x20] sm:$0xff]  ;;  %v718_v39 = vld [vmem:[%s4895_s3 + $0x18] sm:$0xff]  ;;  %v717_v41 = vld [vmem:[%s4895_s3 + $0x10] sm:$0xff] }
  0x6e   : > { %792 = vperm.xlu0 %2860, %v725_v5   ;;  %857 = vperm.xlu1 %2861, %v738_v6   ;;  %v731_v40 = vld [vmem:[%s4895_s3 + $0x80] sm:$0xff]  ;;  %v674_v42 = vld [vmem:[%s4894_s2 + $0x48] sm:$0xff]  ;;  %v671_v43 = vld [vmem:[%s4894_s2 + $0x30] sm:$0xff]  ;;  %p3064_p0 = pnand %p3063_p13, %p3212_p6  ;;  %p3069_p4 = por %p3068_p3, %p3067_p2 }
  0x6f   : > { %949 = vmatpush.msra.mxu0 %v647_v10  ;;  %1047 = vmatpush.msra.mxu1 %v657_v13  ;;  %v716_v44 = vld [vmem:[%s4895_s3 + $0x8] sm:$0xff]  ;;  %v715_v45 = vld [vmem:[%s4895_s3] sm:$0xff]  ;;  %v676_v46 = vld [vmem:[%s4894_s2 + $0x58] sm:$0xff] }
  0x70   : > { %787 = vperm.xlu2 %2862, %v724_v9   ;;  %v673_v47 = vld [vmem:[%s4894_s2 + $0x40] sm:$0xff]  ;;  %v678_v49 = vld [vmem:[%s4894_s2 + $0x68] sm:$0xff]  ;;  %v675_v50 = vld [vmem:[%s4894_s2 + $0x50] sm:$0xff]  ;;  %p3065_p1 = pneg %p3064_p0 }
  0x71   : > { %950 = vmatpush.msra.mxu0 %v646_v12  ;;  %1048 = vmatpush.msra.mxu1 %v656_v15  ;;  %v1163_v48 = vld [vmem:[%s4897_s5 + $0x60] sm:$0xf]  ;;  %v1161_v51 = vld [vmem:[%s4897_s5 + $0x50] sm:$0xff]  ;;  %v1160_v52 = vld [vmem:[%s4897_s5 + $0x48] sm:$0xff] }
  0x72   : > { %2688 = vmatmul.msk.f32.vlgmr.msra.gmra.mxu1 %vm865_vm0, %v666_v19  ;;  %v680_v53 = vld [vmem:[%s4894_s2 + $0x78] sm:$0xff]  ;;  %v677_v54 = vld [vmem:[%s4894_s2 + $0x60] sm:$0xff]  ;;  %v1157_v56 = vld [vmem:[%s4897_s5 + $0x30] sm:$0xff]  ;;  %p3070_p5 = pnand %p3069_p4, %p3065_p1 }
  0x73   : > { %951 = vmatpush.msra.mxu0 %v645_v14  ;;  %v1158_v55 = vld [vmem:[%s4897_s5 + $0x38] sm:$0xff]  ;;  %v682_v57 = vld [vmem:[%s4894_s2 + $0x88] sm:$0xff]  ;;  %v679_v58 = vld [vmem:[%s4894_s2 + $0x70] sm:$0xff] }
  0x74   : > { %v1155_v59 = vld [vmem:[%s4897_s5 + $0x20] sm:$0xff]  ;;  %v1154_v60 = vld [vmem:[%s4897_s5 + $0x18] sm:$0xff]  ;;  %v1152_v0 = vld [vmem:[%s4897_s5 + $0x8] sm:$0xff] }
  0x75   : > { %952 = vmatpush.msra.mxu0 %v644_v18  ;;  %v1162_v61 = vld [vmem:[%s4897_s5 + $0x58] sm:$0xff]  ;;  %v681_v63 = vld [vmem:[%s4894_s2 + $0x80] sm:$0xff]  ;;  %v686_v3 = vld [vmem:[%s4894_s2 + $0xa8] sm:$0xff] }
  0x76   : > { %852 = vperm.xlu0 %2860, %v737_v16   ;;  %782 = vperm.xlu1 %2861, %v723_v17   ;;  %v684_v62 = vld [vmem:[%s4894_s2 + $0x98] sm:$0xff]  ;;  %v1151_v1 = vld [vmem:[%s4897_s5] sm:$0xff]  ;;  %v683_v4 = vld [vmem:[%s4894_s2 + $0x90] sm:$0xff] }
  0x77   : > { %953 = vmatpush.msra.mxu0 %v643_v21  ;;  %v1159_v2 = vld [vmem:[%s4897_s5 + $0x40] sm:$0xff]  ;;  %v1406_v6 = vld [vmem:[%s4899_s7 + $0x8] sm:$0xff]  ;;  %v688_v8 = vld [vmem:[%s4894_s2 + $0xb8] sm:$0xff] }
  0x78   : > { %847 = vperm.xlu2 %2862, %v736_v20   ;;  %v1409_v5 = vld [vmem:[%s4899_s7 + $0x20] sm:$0xff]  ;;  %v1156_v7 = vld [vmem:[%s4897_s5 + $0x28] sm:$0xff]  ;;  %v1408_v12 = vld [vmem:[%s4899_s7 + $0x18] sm:$0xff] }
  0x79   : > { %954 = vmatpush.msra.mxu0 %v642_v22  ;;  %v685_v9 = vld [vmem:[%s4894_s2 + $0xa0] sm:$0xff]  ;;  %v1410_v13 = vld [vmem:[%s4899_s7 + $0x28] sm:$0xff]  ;;  %v1153_v14 = vld [vmem:[%s4897_s5 + $0x10] sm:$0xff] }
  0x7a   : > { %2689 = vmatmul.msk.f32.gmra.mxu1 %vm865_vm0, %v668_v27  ;;  %v690_v15 = vld [vmem:[%s4894_s2 + $0xc8] sm:$0xff]  ;;  %v687_v16 = vld [vmem:[%s4894_s2 + $0xb0] sm:$0xff]  ;;  %v1412_v19 = vld [vmem:[%s4899_s7 + $0x38] sm:$0xff] }
  0x7b   : > { %955 = vmatpush.msra.mxu0 %v641_v23  ;;  %v1413_v20 = vld [vmem:[%s4899_s7 + $0x40] sm:$0xff]  ;;  %v692_v22 = vld [vmem:[%s4894_s2 + $0xd8] sm:$0xff]  ;;  %v1415_v27 = vld [vmem:[%s4899_s7 + $0x50] sm:$0xff] }
  0x7c   : > { %v689_v23 = vld [vmem:[%s4894_s2 + $0xc0] sm:$0xff] }
  0x7d   : > { %956 = vmatpush.msra.mxu0 %v640_v26 }
  0x7e   : > { %777 = vperm.xlu0 %2860, %v722_v24   ;;  %842 = vperm.xlu1 %2861, %v735_v25   ;;  %v1405_v24 = vld [vmem:[%s4899_s7] sm:$0xff] }
  0x7f   : > { %957 = vmatmul.f32.vlgmr.msra.gmra.mxu0 %v665_v28  ;;  %v1416_v28 = vld [vmem:[%s4899_s7 + $0x58] sm:$0xff] }
  0x80   : > { %772 = vperm.xlu2 %2862, %v721_v29  }
  0x82   : > { %2690 = vmatmul.msk.f32.gmra.mxu1 %vm865_vm0, %v670_v32  ;;  %v1407_v32 = vld [vmem:[%s4899_s7 + $0x10] sm:$0xff] }
  0x86   : > { %837 = vperm.xlu0 %2860, %v734_v30   ;;  %767 = vperm.xlu1 %2861, %v720_v31   ;;  %v694_v30 = vld [vmem:[%s4894_s2 + $0xe8] sm:$0xff]  ;;  %v691_v31 = vld [vmem:[%s4894_s2 + $0xd0] sm:$0xff] }
  0x87   : > { %960 = vmatmul.f32.gmra.mxu0 %v667_v33 }
  0x88   : > { %832 = vperm.xlu2 %2862, %v733_v34  }
  0x8a   : > { %2691 = vmatmul.msk.f32.gmra.mxu1 %vm865_vm0, %v672_v37  ;;  %v696_v37 = vld [vmem:[%s4894_s2 + $0xf8] sm:$0xff] }
  0x8e   : > { %762 = vperm.xlu0 %2860, %v719_v35   ;;  %827 = vperm.xlu1 %2861, %v732_v36   ;;  %v1418_v35 = vld [vmem:[%s4899_s7 + $0x68] sm:$0xff]  ;;  %v1419_v36 = vld [vmem:[%s4899_s7 + $0x70] sm:$0xff] }
  0x8f   : > { %963 = vmatmul.f32.gmra.mxu0 %v669_v38 }
  0x90   : > { %757 = vperm.xlu2 %2862, %v718_v39   ;;  %v693_v39 = vld [vmem:[%s4894_s2 + $0xe0] sm:$0xff] }
  0x92   : > { %2692 = vmatmul.msk.f32.gmra.mxu1 %vm865_vm0, %v674_v42 }
  0x96   : > { %822 = vperm.xlu0 %2860, %v731_v40   ;;  %752 = vperm.xlu1 %2861, %v717_v41   ;;  %v1411_v40 = vld [vmem:[%s4899_s7 + $0x30] sm:$0xff] }
  0x97   : > { %966 = vmatmul.f32.gmra.mxu0 %v671_v43  ;;  %v1421_v43 = vld [vmem:[%s4899_s7 + $0x80] sm:$0xff] }
  0x98   : > { %747 = vperm.xlu2 %2862, %v716_v44   ;;  %v1422_v44 = vld [vmem:[%s4899_s7 + $0x88] sm:$0xff] }
  0x9a   : > { %2693 = vmatmul.msk.f32.gmra.mxu1 %vm865_vm0, %v676_v46  ;;  %v698_v46 = vld [vmem:[%s4894_s2 + $0x108] sm:$0xff] }
  0x9e   : > { %742 = vperm.xlu0 %2860, %v715_v45   ;;  %1226 = vperm.xlu1 %2861, %v1163_v48   ;;  %v1414_v48 = vld [vmem:[%s4899_s7 + $0x48] sm:$0xff] }
  0x9f   : > { %969 = vmatmul.f32.gmra.mxu0 %v673_v47  ;;  %v695_v47 = vld [vmem:[%s4894_s2 + $0xf0] sm:$0xff] }
  0xa0   : > { %1221 = vperm.xlu2 %2862, %v1162_v61  }
  0xa2   : > { %2694 = vmatmul.msk.f32.gmra.mxu1 %vm865_vm0, %v678_v49 }
  0xa6   : > { %1216 = vperm.xlu0 %2860, %v1161_v51   ;;  %1211 = vperm.xlu1 %2861, %v1160_v52   ;;  %v1424_v52 = vld [vmem:[%s4899_s7 + $0x98] sm:$0xff] }
  0xa7   : > { %972 = vmatmul.f32.gmra.mxu0 %v675_v50 }
  0xa8   : > { %1206 = vperm.xlu2 %2862, %v1159_v2  }
  0xaa   : > { %2695 = vmatmul.msk.f32.gmra.mxu1 %vm865_vm0, %v680_v53  ;;  %v1425_v53 = vld [vmem:[%s4899_s7 + $0xa0] sm:$0xff] }
  0xae   : > { %1201 = vperm.xlu0 %2860, %v1158_v55   ;;  %1196 = vperm.xlu1 %2861, %v1157_v56   ;;  %v700_v55 = vld [vmem:[%s4894_s2 + $0x118] sm:$0xff] }
  0xaf   : > { %975 = vmatmul.f32.gmra.mxu0 %v677_v54 }
  0xb0   : > { %1191 = vperm.xlu2 %2862, %v1156_v7  }
  0xb2   : > { %2696 = vmatmul.msk.f32.gmra.mxu1 %vm865_vm0, %v682_v57  ;;  %v697_v57 = vld [vmem:[%s4894_s2 + $0x100] sm:$0xff] }
  0xb6   : > { %1186 = vperm.xlu0 %2860, %v1155_v59   ;;  %1181 = vperm.xlu1 %2861, %v1154_v60   ;;  %v1427_v60 = vld [vmem:[%s4899_s7 + $0xb0] sm:$0xff] }
  0xb7   : > { %978 = vmatmul.f32.gmra.mxu0 %v679_v58  ;;  %v1417_v58 = vld [vmem:[%s4899_s7 + $0x60] sm:$0xff] }
  0xb8   : > { %1176 = vperm.xlu2 %2862, %v1153_v14  }
  0xba   : > { %2697 = vmatmul.msk.f32.gmra.mxu1 %vm865_vm0, %v684_v62  ;;  %v3608_v21 = vpop.permute.xlu2 %797 }
  0xbe   : > { %1171 = vperm.xlu0 %2860, %v1152_v0   ;;  %1166 = vperm.xlu1 %2861, %v1151_v1   ;;  %v702_v1 = vld [vmem:[%s4894_s2 + $0x128] sm:$0xff] }
  0xbf   : > { %981 = vmatmul.f32.gmra.mxu0 %v681_v63  ;;  %v1428_v63 = vld [vmem:[%s4899_s7 + $0xb8] sm:$0xff] }
  0xc0   : > { %1432 = vperm.xlu2 %2862, %v1405_v24   ;;  %v706_v24 = vld [vmem:[%s4894_s2 + $0x148] sm:$0xff] }
  0xc2   : > { %2698 = vmatmul.msk.f32.gmra.mxu1 %vm865_vm0, %v686_v3  ;;  %v3630_v29 = vpop.permute.xlu2 %862  ;;  %v699_v3 = vld [vmem:[%s4894_s2 + $0x110] sm:$0xff] }
  0xc6   : > { %1452 = vperm.xlu0 %2860, %v1409_v5   ;;  %1437 = vperm.xlu1 %2861, %v1406_v6  }
  0xc7   : > { %984 = vmatmul.f32.gmra.mxu0 %v683_v4  ;;  %v1420_v4 = vld [vmem:[%s4899_s7 + $0x78] sm:$0xff] }
  0xc8   : > { %1442 = vperm.xlu2 %2862, %v1407_v32   ;;  %v1426_v32 = vld [vmem:[%s4899_s7 + $0xa8] sm:$0xff] }
  0xca   : > { %2699 = vmatmul.msk.f32.gmra.mxu1 %vm865_vm0, %v688_v8  ;;  %v3655_v38 = vpop.permute.xlu2 %787 }
  0xce   : > { %1447 = vperm.xlu0 %2860, %v1408_v12   ;;  %1457 = vperm.xlu1 %2861, %v1410_v13   ;;  %v701_v13 = vld [vmem:[%s4894_s2 + $0x120] sm:$0xff] }
  0xcf   : > { %987 = vmatmul.f32.gmra.mxu0 %v685_v9  ;;  %v704_v9 = vld [vmem:[%s4894_s2 + $0x138] sm:$0xff] }
  0xd0   : > { %v3578_v10 = vpop.permute.xlu0 %817  ;;  %v3580_v11 = vpop.permute.xlu1 %807  ;;  %1462 = vperm.xlu2 %2862, %v1411_v40   ;;  %v705_v40 = vld [vmem:[%s4894_s2 + $0x140] sm:$0xff] }
  0xd2   : > { %2700 = vmatmul.msk.f32.gmra.mxu1 %vm865_vm0, %v690_v15  ;;  %v3683_v49 = vpop.permute.xlu2 %847  ;;  %v1423_v15 = vld [vmem:[%s4899_s7 + $0x90] sm:$0xff] }
  0xd6   : > { %1467 = vperm.xlu0 %2860, %v1412_v19   ;;  %1472 = vperm.xlu1 %2861, %v1413_v20  }
  0xd7   : > { %990 = vmatmul.f32.gmra.mxu0 %v687_v16 }
  0xd8   : > { %v3598_v17 = vpop.permute.xlu0 %812  ;;  %v3600_v18 = vpop.permute.xlu1 %802  ;;  %1477 = vperm.xlu2 %2862, %v1414_v48  }
  0xda   : > { %2701 = vmatmul.msk.f32.gmra.mxu1 %vm865_vm0, %v692_v22  ;;  %v773_v61 = vpop.permute.xlu2 %772 }
  0xde   : > { %1482 = vperm.xlu0 %2860, %v1415_v27   ;;  %1487 = vperm.xlu1 %2861, %v1416_v28  }
  0xdf   : > { %993 = vmatmul.f32.gmra.mxu0 %v689_v23 }
  0xe0   : > { %v3620_v25 = vpop.permute.xlu0 %792  ;;  %v3622_v26 = vpop.permute.xlu1 %857  ;;  %1492 = vperm.xlu2 %2862, %v1417_v58  }
  0xe2   : > { %2702 = vmatmul.msk.f32.gmra.mxu1 %vm865_vm0, %v694_v30  ;;  %v3730_v6 = vpop.permute.xlu2 %832  ;;  %v703_v30 = vld [vmem:[%s4894_s2 + $0x130] sm:$0xff] }
  0xe6   : > { %1497 = vperm.xlu0 %2860, %v1418_v35   ;;  %1502 = vperm.xlu1 %2861, %v1419_v36  }
  0xe7   : > { %996 = vmatmul.f32.gmra.mxu0 %v691_v31 }
  0xe8   : > { %v3642_v33 = vpop.permute.xlu0 %852  ;;  %v3644_v34 = vpop.permute.xlu1 %782  ;;  %1507 = vperm.xlu2 %2862, %v1420_v4  }
  0xea   : > { %2703 = vmatmul.msk.f32.gmra.mxu1 %vm865_vm0, %v696_v37  ;;  %v758_v27 = vpop.permute.xlu2 %757  ;;  %v708_v37 = vld [vmem:[%s4894_s2 + $0x158] sm:$0xff] }
  0xee   : > { %1512 = vperm.xlu0 %2860, %v1421_v43   ;;  %1517 = vperm.xlu1 %2861, %v1422_v44   ;;  %v1429_v44 = vld [vmem:[%s4899_s7 + $0xc0] sm:$0xff] }
  0xef   : > { %999 = vmatmul.f32.gmra.mxu0 %v693_v39  ;;  %v1050_v45 = vpop.f32.mrf.mxu1 }
  0xf0   : > { %v3664_v41 = vpop.permute.xlu0 %777  ;;  %v3666_v42 = vpop.permute.xlu1 %842  ;;  %1522 = vperm.xlu2 %2862, %v1423_v15  }
  0xf2   : > { %2704 = vmatmul.msk.f32.gmra.mxu1 %vm865_vm0, %v698_v46 }
  0xf6   : > { %1527 = vperm.xlu0 %2860, %v1424_v52   ;;  %1532 = vperm.xlu1 %2861, %v1425_v53   ;;  %v707_v52 = vld [vmem:[%s4894_s2 + $0x150] sm:$0xff] }
  0xf7   : > { %1002 = vmatmul.f32.gmra.mxu0 %v695_v47  ;;  %v3696_v54 = vpop.f32.mrf.mxu1  ;;  %v710_v47 = vld [vmem:[%s4894_s2 + $0x168] sm:$0xff] }
  0xf8   : > { %v3686_v50 = vpop.permute.xlu0 %837  ;;  %v3688_v51 = vpop.permute.xlu1 %767  ;;  %1537 = vperm.xlu2 %2862, %v1426_v32  }
  0xfa   : > { %2705 = vmatmul.msk.f32.gmra.mxu1 %vm865_vm0, %v700_v55 }
  0xfc   : > { %v958_v56 = vpop.f32.mrf.mxu0 }
  0xfe   : > { %1542 = vperm.xlu0 %2860, %v1427_v60   ;;  %1547 = vperm.xlu1 %2861, %v1428_v63  }
  0xff   : > { %1005 = vmatmul.f32.gmra.mxu0 %v697_v57  ;;  %v1056_v0 = vpop.f32.mrf.mxu1  ;;  %v712_v57 = vld [vmem:[%s4894_s2 + $0x178] sm:$0xff] }
 0x100   : > { %v763_v59 = vpop.permute.xlu0 %762  ;;  %v3711_v62 = vpop.permute.xlu1 %827  ;;  %1552 = vperm.xlu2 %2862, %v1429_v44  }
 0x102   : > { %2706 = vmatmul.msk.f32.gmra.mxu1 %vm865_vm0, %v702_v1 }
 0x104   : > { %v3719_v2 = vpop.f32.mrf.mxu0 }
 0x107   : > { %1008 = vmatmul.f32.gmra.mxu0 %v699_v3  ;;  %v1059_v8 = vpop.f32.mrf.mxu1  ;;  %v711_v3 = vld [vmem:[%s4894_s2 + $0x170] sm:$0xff] }
 0x108   : > { %v3728_v5 = vpop.permute.xlu0 %822  ;;  %v753_v7 = vpop.permute.xlu1 %752 }
 0x10a   : > { %2707 = vmatmul.msk.f32.gmra.mxu1 %vm865_vm0, %v704_v9  ;;  %v713_v9 = vld [vmem:[%s4894_s2 + $0x180] sm:$0xff] }
 0x10c   : > { %v964_v12 = vpop.f32.mrf.mxu0 }
 0x10d   : > { %v965_v14 = vadd.f32 %v964_v12, %v753_v7 }
 0x10f   : > { %v3742_v16 = vadd.f32 %v1056_v0, %v965_v14  ;;  %1011 = vmatmul.f32.gmra.mxu0 %v701_v13  ;;  %v1062_v23 = vpop.f32.mrf.mxu1  ;;  %v714_v0 = vld [vmem:[%s4894_s2 + $0x188] sm:$0xff] }
 0x110   : > { %v743_v19 = vpop.permute.xlu0 %742 }
 0x111   : > { %v959_v20 = vadd.f32 %v958_v56, %v743_v19 }
 0x112   : > { %2708 = vmatmul.msk.f32.gmra.mxu1 %vm865_vm0, %v706_v24 }
 0x113   : > { %v3744_v22 = vadd.f32 %v1050_v45, %v959_v20 }
 0x114   : > { %v967_v28 = vpop.f32.mrf.mxu0 }
 0x115   : > { %v968_v31 = vadd.f32 %v967_v28, %v758_v27 }
 0x117   : > { %v3756_v35 = vadd.f32 %v1059_v8, %v968_v31  ;;  %1014 = vmatmul.f32.gmra.mxu0 %v703_v30  ;;  %v1065_v36 = vpop.f32.mrf.mxu1 }
 0x11a   : > { %2709 = vmatmul.msk.f32.gmra.mxu1 %vm865_vm0, %v708_v37 }
 0x11c   : > { %v970_v39 = vpop.f32.mrf.mxu0 }
 0x11d   : > { %v971_v43 = vadd.f32 %v970_v39, %v763_v59  ;;  %v709_v59 = vld [vmem:[%s4894_s2 + $0x160] sm:$0xff] }
 0x11f   : > { %v3768_v45 = vadd.f32 %v1062_v23, %v971_v43  ;;  %1017 = vmatmul.f32.gmra.mxu0 %v705_v40  ;;  %v1068_v46 = vpop.f32.mrf.mxu1 }
 0x122   : > { %2710 = vmatmul.msk.f32.gmra.mxu1 %vm865_vm0, %v710_v47 }
 0x124   : > { %v973_v48 = vpop.f32.mrf.mxu0 }
 0x125   : > { %v974_v53 = vadd.f32 %v973_v48, %v3688_v51 }
 0x127   : > { %v3778_v55 = vadd.f32 %v1065_v36, %v974_v53  ;;  %1020 = vmatmul.f32.gmra.mxu0 %v707_v52  ;;  %v1071_v56 = vpop.f32.mrf.mxu1 }
 0x12a   : > { %2711 = vmatmul.msk.f32.gmra.mxu1 %vm865_vm0, %v712_v57 }
 0x12c   : > { %v976_v58 = vpop.f32.mrf.mxu0 }
 0x12d   : > { %v977_v60 = vadd.f32 %v976_v58, %v773_v61 }
 0x12f   : > { %v3787_v63 = vadd.f32 %v1068_v46, %v977_v60  ;;  %1023 = vmatmul.f32.gmra.mxu0 %v709_v59  ;;  %v1074_v51 = vpop.f32.mrf.mxu1 }
 0x132   : > { %2712 = vmatmul.msk.f32.gmra.mxu1 %vm865_vm0, %v714_v0 }
 0x134   : > { %v979_v1 = vpop.f32.mrf.mxu0 }
 0x135   : > { %v980_v4 = vadd.f32 %v979_v1, %v3664_v41 }
 0x137   : > { %v3797_v61 = vadd.f32 %v1071_v56, %v980_v4  ;;  %1026 = vmatmul.f32.gmra.mxu0 %v711_v3  ;;  %v1077_v7 = vpop.f32.mrf.mxu1 }
 0x13c   : > { %v982_v8 = vpop.f32.mrf.mxu0 }
 0x13d   : > { %v983_v12 = vadd.f32 %v982_v8, %v3644_v34  ;;  %v1129_v8 = vld [vmem:[%s4896_s4 + $0x20] sm:$0xff] }
 0x13f   : > { %v3803_v13 = vadd.f32 %v1074_v51, %v983_v12  ;;  %1029 = vmatmul.f32.gmra.mxu0 %v713_v9  ;;  %v1080_v14 = vpop.f32.mrf.mxu1 }
 0x144   : > { %v985_v15 = vpop.f32.mrf.mxu0 }
 0x147   : > { %v1083_v19 = vpop.f32.mrf.mxu1 }
 0x14c   : > { %v988_v41 = vpop.f32.mrf.mxu0 }
 0x14f   : > { %v1086_v20 = vpop.f32.mrf.mxu1 }
 0x154   : > { %v991_v23 = vpop.f32.mrf.mxu0 }
 0x155   : > { %v992_v47 = vadd.f32 %v991_v23, %v3608_v21  ;;  %v986_v21 = vadd.f32 %v985_v15, %v3655_v38 }
 0x157   : > { %v1089_v24 = vpop.f32.mrf.mxu1  ;;  %v3827_v53 = vadd.f32 %v1083_v19, %v992_v47 }
 0x15c   : > { %v994_v27 = vpop.f32.mrf.mxu0 }
 0x15d   : > { %v995_v44 = vadd.f32 %v994_v27, %v3600_v18 }
 0x15f   : > { %v1092_v28 = vpop.f32.mrf.mxu1  ;;  %v3821_v52 = vadd.f32 %v1086_v20, %v995_v44 }
 0x164   : > { %v997_v30 = vpop.f32.mrf.mxu0 }
 0x165   : > { %v998_v40 = vadd.f32 %v997_v30, %v3580_v11 }
 0x167   : > { %v1095_v31 = vpop.f32.mrf.mxu1  ;;  %v3816_v48 = vadd.f32 %v1089_v24, %v998_v40  ;;  %v1135_v24 = vld [vmem:[%s4896_s4 + $0x50] sm:$0xff] }
 0x16c   : > { %v1000_v32 = vpop.f32.mrf.mxu0 }
 0x16d   : > { %v1001_v39 = vadd.f32 %v1000_v32, %v3598_v17  ;;  %v989_v17 = vadd.f32 %v988_v41, %v3620_v25  ;;  %v3837_v25 = vadd.f32 %v1077_v7, %v986_v21  ;;  %v1127_v7 = vld [vmem:[%s4896_s4 + $0x10] sm:$0xff]  ;;  %v1133_v41 = vld [vmem:[%s4896_s4 + $0x40] sm:$0xff]  ;;  %v1130_v21 = vld [vmem:[%s4896_s4 + $0x28] sm:$0xff] }
 0x16e   : > { %v1137_v32 = vld [vmem:[%s4896_s4 + $0x60] sm:$0xff] }
 0x16f   : > { %v1098_v36 = vpop.f32.mrf.mxu1  ;;  %v3811_v46 = vadd.f32 %v1092_v28, %v1001_v39  ;;  %v3833_v57 = vadd.f32 %v1080_v14, %v989_v17  ;;  %v1131_v14 = vld [vmem:[%s4896_s4 + $0x30] sm:$0xff]  ;;  %v1128_v17 = vld [vmem:[%s4896_s4 + $0x18] sm:$0xff] }
 0x174   : > { %v1003_v37 = vpop.f32.mrf.mxu0 }
 0x175   : > { %v1004_v34 = vadd.f32 %v1003_v37, %v3578_v10 }
 0x177   : > { %v3808_v43 = vadd.f32 %v1095_v31, %v1004_v34  ;;  %v1101_v10 = vpop.f32.mrf.mxu1 }
 0x179   : > { %1268 = vmatpush.msrb.mxu1 %v3808_v43  ;;  %2784 = vmatpush.msra.mxu2 %v3808_v43 }
 0x17b   : > { %1269 = vmatpush.msrb.mxu1 %v3811_v46  ;;  %2785 = vmatpush.msra.mxu2 %v3811_v46 }
 0x17c   : > { %v1006_v11 = vpop.f32.mrf.mxu0 }
 0x17d   : > { %v1007_v18 = vadd.f32 %v1006_v11, %v3728_v5  ;;  %1270 = vmatpush.msrb.mxu1 %v3816_v48  ;;  %2786 = vmatpush.msra.mxu2 %v3816_v48  ;;  %v1143_v11 = vld [vmem:[%s4896_s4 + $0x90] sm:$0xff] }
 0x17f   : > { %v3829_v56 = vadd.f32 %v1098_v36, %v1007_v18  ;;  %1271 = vmatpush.msrb.mxu1 %v3821_v52  ;;  %2787 = vmatpush.msra.mxu2 %v3821_v52  ;;  %v3841_v38 = vpop.f32.mrf.mxu1  ;;  %v1145_v18 = vld [vmem:[%s4896_s4 + $0xa0] sm:$0xff] }
 0x181   : > { %1272 = vmatpush.msrb.mxu1 %v3827_v53  ;;  %2788 = vmatpush.msra.mxu2 %v3827_v53 }
 0x183   : > { %1273 = vmatpush.msrb.mxu1 %v3833_v57  ;;  %2789 = vmatpush.msra.mxu2 %v3833_v57 }
 0x184   : > { %v1009_v5 = vpop.f32.mrf.mxu0 }
 0x185   : > { %v1010_v58 = vadd.f32 %v1009_v5, %v3711_v62  ;;  %1274 = vmatpush.msrb.mxu1 %v3837_v25  ;;  %2790 = vmatpush.msra.mxu2 %v3837_v25  ;;  %v748_v62 = vpop.permute.xlu2 %747  ;;  %v1132_v5 = vld [vmem:[%s4896_s4 + $0x38] sm:$0xff] }
 0x186   : > { %v962_v0 = vadd.f32 %v3719_v2, %v748_v62  ;;  %v1125_v2 = vld [vmem:[%s4896_s4] sm:$0xff]  ;;  %v1136_v62 = vld [vmem:[%s4896_s4 + $0x58] sm:$0xff] }
 0x187   : > { %v3846_v59 = vadd.f32 %v1101_v10, %v1010_v58  ;;  %1275 = vmatpush.msrb.mxu1 %v3803_v13  ;;  %2791 = vmatpush.msra.mxu2 %v3803_v13  ;;  %v1107_v60 = vpop.f32.mrf.mxu1  ;;  %v1126_v10 = vld [vmem:[%s4896_s4 + $0x8] sm:$0xff]  ;;  %v1149_v58 = vld [vmem:[%s4896_s4 + $0xc0] sm:$0xf] }
 0x188   : > { %v3862_v1 = vadd.f32 %v3696_v54, %v962_v0  ;;  %v1140_v0 = vld [vmem:[%s4896_s4 + $0x78] sm:$0xff] }
 0x189   : > { %1276 = vmatpush.msrb.mxu1 %v3797_v61  ;;  %2792 = vmatpush.msra.mxu2 %v3797_v61 }
 0x18b   : > { %1277 = vmatpush.msrb.mxu1 %v3787_v63  ;;  %2793 = vmatpush.msra.mxu2 %v3787_v63 }
 0x18c   : > { %v1012_v51 = vpop.f32.mrf.mxu0 }
 0x18d   : > { %1278 = vmatpush.msrb.mxu1 %v3778_v55  ;;  %2794 = vmatpush.msra.mxu2 %v3778_v55 }
 0x18f   : > { %1279 = vmatpush.msrb.mxu1 %v3768_v45  ;;  %2795 = vmatpush.msra.mxu2 %v3768_v45  ;;  %v1110_v4 = vpop.f32.mrf.mxu1 }
 0x191   : > { %1280 = vmatpush.msrb.mxu1 %v3756_v35  ;;  %2796 = vmatpush.msra.mxu2 %v3756_v35 }
 0x193   : > { %1281 = vmatpush.msrb.mxu1 %v3742_v16  ;;  %2797 = vmatpush.msra.mxu2 %v3742_v16 }
 0x194   : > { %v1015_v3 = vpop.f32.mrf.mxu0 }
 0x195   : > { %1282 = vmatpush.msrb.mxu1 %v3862_v1  ;;  %2798 = vmatpush.msra.mxu2 %v3862_v1 }
 0x197   : > { %1283 = vmatpush.msrb.mxu1 %v3744_v22  ;;  %2799 = vmatpush.msra.mxu2 %v3744_v22  ;;  %v1113_v9 = vpop.f32.mrf.mxu1 }
 0x198   : > { %1284 = vmatmul.f32.vlgmr.msrb.gmra.mxu1 %v1125_v2  ;;  %1287 = vmatmul.f32.vlgmr.msra.gmra.mxu2 %v1127_v7  ;;  %v1146_v2 = vld [vmem:[%s4896_s4 + $0xa8] sm:$0xff]  ;;  %v1148_v7 = vld [vmem:[%s4896_s4 + $0xb8] sm:$0xff] }
 0x19c   : > { %v1018_v54 = vpop.f32.mrf.mxu0 }
 0x19d   : > { %v1019_v40 = vadd.f32 %v1018_v54, %v3666_v42  ;;  %v1150_v54 = vld [vmem:[%s4896_s4 + $0xc8] sm:$0xf] }
 0x19f   : > { %v1116_v15 = vpop.f32.mrf.mxu1  ;;  %v3912_v47 = vadd.f32 %v1110_v4, %v1019_v40  ;;  %v1144_v4 = vld [vmem:[%s4896_s4 + $0x98] sm:$0xff] }
 0x1a0   : > { %1290 = vmatmul.f32.gmra.mxu2 %v1129_v8 }
 0x1a4   : > { %v1021_v12 = vpop.f32.mrf.mxu0 }
 0x1a5   : > { %v1022_v39 = vadd.f32 %v1021_v12, %v3683_v49  ;;  %v1013_v49 = vadd.f32 %v1012_v51, %v3730_v6  ;;  %v1141_v6 = vld [vmem:[%s4896_s4 + $0x80] sm:$0xff]  ;;  %v1138_v51 = vld [vmem:[%s4896_s4 + $0x68] sm:$0xff] }
 0x1a7   : > { %v1119_v20 = vpop.f32.mrf.mxu1  ;;  %v3905_v44 = vadd.f32 %v1113_v9, %v1022_v39  ;;  %v1227_v9 = vpop.permute.xlu1 %1226 }
 0x1a8   : > { %1293 = vmatmul.f32.gmra.mxu2 %v1131_v14 }
 0x1ac   : > { %v1024_v19 = vpop.f32.mrf.mxu0 }
 0x1ad   : > { %v1025_v36 = vadd.f32 %v1024_v19, %v3642_v33  ;;  %v1139_v33 = vld [vmem:[%s4896_s4 + $0x70] sm:$0xff] }
 0x1af   : > { %v1122_v28 = vpop.f32.mrf.mxu1 }
 0x1b0   : > { %1296 = vmatmul.f32.gmra.mxu2 %v1133_v41 }
 0x1b4   : > { %v1027_v23 = vpop.f32.mrf.mxu0 }
 0x1b5   : > { %v1028_v30 = vadd.f32 %v1027_v23, %v3622_v26  ;;  %v3901_v26 = vadd.f32 %v1116_v15, %v1025_v36  ;;  %v1212_v15 = vpop.permute.xlu1 %1211 }
 0x1b7   : > { %v3897_v34 = vadd.f32 %v1119_v20, %v1028_v30  ;;  %v1217_v20 = vpop.permute.xlu0 %1216 }
 0x1b8   : > { %1299 = vmatmul.f32.gmra.mxu2 %v1135_v24 }
 0x1bc   : > { %v1030_v27 = vpop.f32.mrf.mxu0 }
 0x1bd   : > { %v1031_v31 = vadd.f32 %v1030_v27, %v3630_v29  ;;  %v1016_v29 = vadd.f32 %v1015_v3, %v3686_v50  ;;  %v3919_v50 = vadd.f32 %v3841_v38, %v1013_v49  ;;  %v1147_v38 = vld [vmem:[%s4896_s4 + $0xb0] sm:$0xff]  ;;  %v1142_v3 = vld [vmem:[%s4896_s4 + $0x88] sm:$0xff]  ;;  %v1197_v23 = vpop.permute.xlu1 %1196 }
 0x1bf   : > { %v3894_v37 = vadd.f32 %v1122_v28, %v1031_v31  ;;  %v3915_v42 = vadd.f32 %v1107_v60, %v1016_v29  ;;  %v1134_v60 = vld [vmem:[%s4896_s4 + $0x48] sm:$0xff]  ;;  %v1222_v28 = vpop.permute.xlu2 %1221  ;;  %v1202_v30 = vpop.permute.xlu0 %1201 }
 0x1c0   : > { %1302 = vmatmul.f32.gmra.mxu2 %v1137_v32 }
 0x1c1   : > { %1331 = vmatpush.msra.mxu3 %v3894_v37 }
 0x1c3   : > { %1332 = vmatpush.msra.mxu3 %v3897_v34 }
 0x1c5   : > { %1333 = vmatpush.msra.mxu3 %v3901_v26  ;;  %v1182_v31 = vpop.permute.xlu1 %1181 }
 0x1c7   : > { %1334 = vmatpush.msra.mxu3 %v3905_v44  ;;  %v1207_v29 = vpop.permute.xlu2 %1206 }
 0x1c8   : > { %1305 = vmatmul.f32.gmra.mxu2 %v1139_v33  ;;  %v1187_v33 = vpop.permute.xlu0 %1186 }
 0x1c9   : > { %1335 = vmatpush.msra.mxu3 %v3912_v47 }
 0x1cb   : > { %1336 = vmatpush.msra.mxu3 %v3915_v42 }
 0x1cd   : > { %1337 = vmatpush.msra.mxu3 %v3919_v50 }
 0x1cf   : > { %1338 = vmatpush.msra.mxu3 %v3846_v59 }
 0x1d0   : > { %1308 = vmatmul.f32.gmra.mxu2 %v1141_v6 }
 0x1d1   : > { %1339 = vmatpush.msra.mxu3 %v3829_v56 }
 0x1d2   : > { %2713 = vmatmul.msk.f32.vlgmr.msra.gmra.mxu3 %vm865_vm0, %v1126_v10 }
 0x1d8   : > { %1311 = vmatmul.f32.gmra.mxu2 %v1143_v11 }
 0x1da   : > { %2714 = vmatmul.msk.f32.gmra.mxu3 %vm865_vm0, %v1128_v17  ;;  %v1192_v17 = vpop.permute.xlu2 %1191 }
 0x1e0   : > { %1314 = vmatmul.f32.gmra.mxu2 %v1145_v18 }
 0x1e2   : > { %2715 = vmatmul.msk.f32.gmra.mxu3 %vm865_vm0, %v1130_v21 }
 0x1e8   : > { %1317 = vmatmul.f32.gmra.mxu2 %v1147_v38 }
 0x1ea   : > { %2716 = vmatmul.msk.f32.gmra.mxu3 %vm865_vm0, %v1132_v5 }
 0x1f0   : > { %1320 = vmatmul.f32.gmra.mxu2 %v1149_v58 }
 0x1f2   : > { %2717 = vmatmul.msk.f32.gmra.mxu3 %vm865_vm0, %v1134_v60 }
 0x1fa   : > { %2718 = vmatmul.msk.f32.gmra.mxu3 %vm865_vm0, %v1136_v62 }
 0x202   : > { %2719 = vmatmul.msk.f32.gmra.mxu3 %vm865_vm0, %v1138_v51 }
 0x20a   : > { %2720 = vmatmul.msk.f32.gmra.mxu3 %vm865_vm0, %v1140_v0 }
 0x212   : > { %2721 = vmatmul.msk.f32.gmra.mxu3 %vm865_vm0, %v1142_v3 }
 0x21a   : > { %2722 = vmatmul.msk.f32.gmra.mxu3 %vm865_vm0, %v1144_v4 }
 0x21b   : > { %v3992_v8 = vpop.f32.mrf.mxu2 }
 0x222   : > { %2723 = vmatmul.msk.f32.gmra.mxu3 %vm865_vm0, %v1146_v2 }
 0x223   : > { %v3994_v12 = vpop.f32.mrf.mxu2 }
 0x22a   : > { %2724 = vmatmul.msk.f32.gmra.mxu3 %vm865_vm0, %v1148_v7 }
 0x22b   : > { %v1294_v19 = vpop.f32.mrf.mxu2 }
 0x22c   : > { %v1295_v36 = vadd.f32 %v1294_v19, %v1182_v31 }
 0x232   : > { %2725 = vmatmul.msk.f32.gmra.mxu3 %vm865_vm0, %v1150_v54 }
 0x233   : > { %v1297_v24 = vpop.f32.mrf.mxu2 }
 0x234   : > { %v1298_v49 = vadd.f32 %v1297_v24, %v1187_v33 }
 0x23b   : > { %v1300_v32 = vpop.f32.mrf.mxu2 }
 0x23c   : > { %v1301_v18 = vadd.f32 %v1300_v32, %v1192_v17 }
 0x243   : > { %v1303_v6 = vpop.f32.mrf.mxu2 }
 0x24b   : > { %v1306_v5 = vpop.f32.mrf.mxu2 }
 0x253   : > { %v1309_v60 = vpop.f32.mrf.mxu2 }
 0x254   : > { %v1310_v17 = vadd.f32 %v1309_v60, %v1207_v29 }
 0x255   : > { %v3996_v14 = vpop.f32.mrf.mxu3 }
 0x25b   : > { %v1312_v51 = vpop.f32.mrf.mxu2 }
 0x25d   : > { %v3998_v41 = vpop.f32.mrf.mxu3 }
 0x263   : > { %v1315_v3 = vpop.f32.mrf.mxu2 }
 0x264   : > { %v1316_v32 = vadd.f32 %v1315_v3, %v1217_v20  ;;  %v2379_v3 = vld [vmem:[%s4018_s26 + $0x18] sm:$0xff] }
 0x265   : > { %v4000_v27 = vpop.f32.mrf.mxu3 }
 0x26b   : > { %v1318_v7 = vpop.f32.mrf.mxu2 }
 0x26d   : > { %v1350_v39 = vpop.f32.mrf.mxu3 }
 0x26e   : > { %v1351_v40 = vadd.f32 %v1350_v39, %v1295_v36  ;;  %v1319_v36 = vadd.f32 %v1318_v7, %v1222_v28  ;;  %v1304_v28 = vadd.f32 %v1303_v6, %v1197_v23  ;;  %v1167_v6 = vpop.permute.xlu1 %1166 }
 0x273   : > { %v1321_v19 = vpop.f32.mrf.mxu2 }
 0x274   : > { %v1322_v24 = vadd.f32 %v1321_v19, %v1227_v9  ;;  %v2381_v19 = vld [vmem:[%s4018_s26 + $0x28] sm:$0xff] }
 0x275   : > { %v1353_v10 = vpop.f32.mrf.mxu3 }
 0x276   : > { %v1354_v11 = vadd.f32 %v1353_v10, %v1298_v49  ;;  %v1313_v49 = vadd.f32 %v1312_v51, %v1212_v15  ;;  %v1177_v15 = vpop.permute.xlu2 %1176  ;;  %v2378_v51 = vld [vmem:[%s4018_s26 + $0x10] sm:$0xff] }
 0x277   : > { %v1292_v29 = vadd.f32 %v3994_v12, %v1177_v15  ;;  %v2387_v15 = vld [vmem:[%s4018_s26 + $0x58] sm:$0xff] }
 0x279   : > { %v1348_v23 = vadd.f32 %v4000_v27, %v1292_v29  ;;  %v1381_v27 = vld [vmem:[%s4898_s6 + $0x8] sm:$0xff] }
 0x27d   : > { %v1356_v21 = vpop.f32.mrf.mxu3 }
 0x27e   : > { %v1357_v38 = vadd.f32 %v1356_v21, %v1301_v18  ;;  %v1307_v21 = vadd.f32 %v1306_v5, %v1202_v30  ;;  %v1172_v30 = vpop.permute.xlu0 %1171  ;;  %v1285_v5 = vpop.f32.mrf.mxu1 }
 0x27f   : > { %v1289_v60 = vadd.f32 %v3992_v8, %v1172_v30  ;;  %v1391_v8 = vld [vmem:[%s4898_s6 + $0x58] sm:$0xff] }
 0x280   : > { %v2388_v30 = vld [vmem:[%s4018_s26 + $0x60] sm:$0xff] }
 0x285   : > { %v1359_v58 = vpop.f32.mrf.mxu3 }
 0x286   : > { %v1360_v20 = vadd.f32 %v1359_v58, %v1304_v28  ;;  %v1286_v58 = vadd.f32 %v1285_v5, %v1167_v6  ;;  %v1395_v6 = vld [vmem:[%s4898_s6 + $0x78] sm:$0xff] }
 0x288   : > { %v1342_v12 = vadd.f32 %v3996_v14, %v1286_v58  ;;  %v2376_v14 = vld [vmem:[%s4018_s26] sm:$0xff] }
 0x28d   : > { %v1362_v62 = vpop.f32.mrf.mxu3 }
 0x28e   : > { %v1363_v7 = vadd.f32 %v1362_v62, %v1307_v21  ;;  %v1383_v21 = vld [vmem:[%s4898_s6 + $0x18] sm:$0xff] }
 0x295   : > { %v1365_v0 = vpop.f32.mrf.mxu3 }
 0x296   : > { %v1366_v9 = vadd.f32 %v1365_v0, %v1310_v17 }
 0x29d   : > { %v1368_v4 = vpop.f32.mrf.mxu3 }
 0x29e   : > { %v1369_v18 = vadd.f32 %v1368_v4, %v1313_v49 }
 0x2a5   : > { %v1371_v2 = vpop.f32.mrf.mxu3 }
 0x2a6   : > { %v1372_v10 = vadd.f32 %v1371_v2, %v1316_v32  ;;  %v2380_v2 = vld [vmem:[%s4018_s26 + $0x20] sm:$0xff] }
 0x2ad   : > { %v1374_v54 = vpop.f32.mrf.mxu3 }
 0x2ae   : > { %v1375_v33 = vadd.f32 %v1374_v54, %v1319_v36 }
 0x2b5   : > { %v1377_v31 = vpop.f32.mrf.mxu3 }
 0x2b6   : > { %v1378_v39 = vadd.f32 %v1377_v31, %v1322_v24  ;;  %v1382_v24 = vld [vmem:[%s4898_s6 + $0x10] sm:$0xff]  ;;  %v1393_v31 = vld [vmem:[%s4898_s6 + $0x68] sm:$0xff] }
 0x2b8   : > { %2726 = vmatpush.msk.msrb.mxu2 %vm1631_vm1, %v1378_v39  ;;  %2800 = vmatpush.msk.msrb.mxu3 %vm1631_vm1, %v1378_v39  ;;  %v2382_v39 = vld [vmem:[%s4018_s26 + $0x30] sm:$0xff] }
 0x2ba   : > { %1639 = vmatpush.msrb.mxu2 %v1375_v33  ;;  %2801 = vmatpush.msrb.mxu3 %v1375_v33  ;;  %v2383_v33 = vld [vmem:[%s4018_s26 + $0x38] sm:$0xff] }
 0x2bc   : > { %1640 = vmatpush.msrb.mxu2 %v1372_v10  ;;  %2802 = vmatpush.msrb.mxu3 %v1372_v10  ;;  %v2384_v10 = vld [vmem:[%s4018_s26 + $0x40] sm:$0xff] }
 0x2be   : > { %1641 = vmatpush.msrb.mxu2 %v1369_v18  ;;  %2803 = vmatpush.msrb.mxu3 %v1369_v18  ;;  %v2385_v18 = vld [vmem:[%s4018_s26 + $0x48] sm:$0xff] }
 0x2c0   : > { %1642 = vmatpush.msrb.mxu2 %v1366_v9  ;;  %2804 = vmatpush.msrb.mxu3 %v1366_v9  ;;  %v1394_v9 = vld [vmem:[%s4898_s6 + $0x70] sm:$0xff] }
 0x2c2   : > { %1643 = vmatpush.msrb.mxu2 %v1363_v7  ;;  %2805 = vmatpush.msrb.mxu3 %v1363_v7  ;;  %v2386_v7 = vld [vmem:[%s4018_s26 + $0x50] sm:$0xff] }
 0x2c4   : > { %1644 = vmatpush.msrb.mxu2 %v1360_v20  ;;  %2806 = vmatpush.msrb.mxu3 %v1360_v20 }
 0x2c6   : > { %1645 = vmatpush.msrb.mxu2 %v1357_v38  ;;  %2807 = vmatpush.msrb.mxu3 %v1357_v38  ;;  %v1345_v38 = vadd.f32 %v3998_v41, %v1289_v60  ;;  %v2377_v41 = vld [vmem:[%s4018_s26 + $0x8] sm:$0xff] }
 0x2c7   : > { %v2401_v62 = vadd.f32 %v2377_v41, %v2376_v14  ;;  %v2389_v60 = vld [vmem:[%s4018_s26 + $0x68] sm:$0xff]  ;;  %v3111_v41 = vmov 25.0  }
 0x2c8   : > { %1646 = vmatpush.msrb.mxu2 %v1354_v11  ;;  %2808 = vmatpush.msrb.mxu3 %v1354_v11  ;;  %v1380_v11 = vld [vmem:[%s4898_s6] sm:$0xff]  ;;  %2863 = vrcp.f32 %v3111_v41  ;;  %v1403_v41 = vld [vmem:[%s4898_s6 + $0xb8] sm:$0xff] }
 0x2c9   : > { %v2402_v0 = vadd.f32 %v2401_v62, %v2378_v51  ;;  %v2394_v62 = vld [vmem:[%s4018_s26 + $0x90] sm:$0xff] }
 0x2ca   : > { %1647 = vmatpush.msrb.mxu2 %v1351_v40  ;;  %2809 = vmatpush.msrb.mxu3 %v1351_v40  ;;  %v1392_v40 = vld [vmem:[%s4898_s6 + $0x60] sm:$0xff]  ;;  %v1385_v51 = vld [vmem:[%s4898_s6 + $0x28] sm:$0xff] }
 0x2cb   : > { %v2403_v4 = vadd.f32 %v2402_v0, %v2379_v3  ;;  %v1396_v0 = vld [vmem:[%s4898_s6 + $0x80] sm:$0xff] }
 0x2cc   : > { %1648 = vmatpush.msrb.mxu2 %v1348_v23  ;;  %2810 = vmatpush.msrb.mxu3 %v1348_v23  ;;  %v1384_v23 = vld [vmem:[%s4898_s6 + $0x20] sm:$0xff] }
 0x2cd   : > { %v2404_v54 = vadd.f32 %v2403_v4, %v2380_v2  ;;  %v2395_v4 = vld [vmem:[%s4018_s26 + $0x98] sm:$0xff] }
 0x2ce   : > { %1649 = vmatpush.msrb.mxu2 %v1345_v38  ;;  %2811 = vmatpush.msrb.mxu3 %v1345_v38  ;;  %v2390_v38 = vld [vmem:[%s4018_s26 + $0x70] sm:$0xff]  ;;  %v2864_v2 = vpop.eup %2863 }
 0x2cf   : > { %v2405_v36 = vadd.f32 %v2404_v54, %v2381_v19  ;;  %v2396_v19 = vld [vmem:[%s4018_s26 + $0xa0] sm:$0xff]  ;;  %vm2430_vm3 = vweird.f32 %v2864_v2 }
 0x2d0   : > { %1650 = vmatpush.msrb.mxu2 %v1342_v12  ;;  %2812 = vmatpush.msrb.mxu3 %v1342_v12 }
 0x2d1   : > { %2727 = vmatmul.msk.f32.vlgmr.msrb.gmra.mxu2 %vm1555_vm2, %v1380_v11  ;;  %2738 = vmatmul.msk.f32.vlgmr.msrb.gmra.mxu3 %vm1555_vm2, %v1391_v8  ;;  %v2406_v32 = vadd.f32 %v2405_v36, %v2382_v39  ;;  %v2391_v11 = vld [vmem:[%s4018_s26 + $0x78] sm:$0xff]  ;;  %v2392_v8 = vld [vmem:[%s4018_s26 + $0x80] sm:$0xff]  ;;  %v2397_v36 = vld [vmem:[%s4018_s26 + $0xa8] sm:$0xff] }
 0x2d3   : > { %v2407_v49 = vadd.f32 %v2406_v32, %v2383_v33  ;;  %v2398_v33 = vld [vmem:[%s4018_s26 + $0xb0] sm:$0xff] }
 0x2d5   : > { %v2408_v17 = vadd.f32 %v2407_v49, %v2384_v10  ;;  %v1386_v10 = vld [vmem:[%s4898_s6 + $0x30] sm:$0xff] }
 0x2d7   : > { %v2409_v28 = vadd.f32 %v2408_v17, %v2385_v18  ;;  %v1397_v17 = vld [vmem:[%s4898_s6 + $0x88] sm:$0xff] }
 0x2d9   : > { %2728 = vmatmul.msk.f32.gmra.mxu2 %vm1555_vm2, %v1381_v27  ;;  %2739 = vmatmul.msk.f32.gmra.mxu3 %vm1555_vm2, %v1392_v40  ;;  %v2410_v20 = vadd.f32 %v2409_v28, %v2386_v7  ;;  %v2393_v27 = vld [vmem:[%s4018_s26 + $0x88] sm:$0xff]  ;;  %v2400_v7 = vld [vmem:[%s4018_s26 + $0xc0] sm:$0xff] }
 0x2db   : > { %v2411_v29 = vadd.f32 %v2410_v20, %v2387_v15 }
 0x2dd   : > { %v2412_v5 = vadd.f32 %v2411_v29, %v2388_v30  ;;  %v1387_v30 = vld [vmem:[%s4898_s6 + $0x38] sm:$0xff] }
 0x2df   : > { %v2413_v58 = vadd.f32 %v2412_v5, %v2389_v60  ;;  %v1398_v5 = vld [vmem:[%s4898_s6 + $0x90] sm:$0xff] }
 0x2e1   : > { %2729 = vmatmul.msk.f32.gmra.mxu2 %vm1555_vm2, %v1382_v24  ;;  %2740 = vmatmul.msk.f32.gmra.mxu3 %vm1555_vm2, %v1393_v31  ;;  %v2414_v12 = vadd.f32 %v2413_v58, %v2390_v38  ;;  %v2426_v24 = vmul.f32 25.0, %v2864_v2  ;;  %v1389_v58 = vld [vmem:[%s4898_s6 + $0x48] sm:$0xff]  ;;  %v1400_v38 = vld [vmem:[%s4898_s6 + $0xa0] sm:$0xff] }
 0x2e3   : > { %v2415_v14 = vadd.f32 %v2414_v12, %v2391_v11  ;;  %v2427_v39 = vsub.f32 1.0, %v2426_v24  ;;  %v1390_v12 = vld [vmem:[%s4898_s6 + $0x50] sm:$0xff]  ;;  %v1401_v11 = vld [vmem:[%s4898_s6 + $0xa8] sm:$0xff] }
 0x2e5   : > { %v2416_v40 = vadd.f32 %v2415_v14, %v2392_v8  ;;  %v2428_v49 = vmul.f32 %v2864_v2, %v2427_v39  ;;  %v1402_v8 = vld [vmem:[%s4898_s6 + $0xb0] sm:$0xff]  ;;  %v2433_v14 = vld [vmem:[%s4900_s8] sm:$0xf] }
 0x2e7   : > { %v2417_v3 = vadd.f32 %v2416_v40, %v2393_v27  ;;  %v1433_v27 = vpop.permute.xlu2 %1432  ;;  %v1438_v40 = vpop.permute.xlu1 %1437 }
 0x2e9   : > { %2730 = vmatmul.msk.f32.gmra.mxu2 %vm1555_vm2, %v1383_v21  ;;  %2741 = vmatmul.msk.f32.gmra.mxu3 %vm1555_vm2, %v1394_v9  ;;  %v2418_v54 = vadd.f32 %v2417_v3, %v2394_v62  ;;  %v2399_v21 = vld [vmem:[%s4018_s26 + $0xb8] sm:$0xff]  ;;  %v2429_v9 = vadd.f32 %v2864_v2, %v2428_v49  ;;  %v1404_v62 = vld [vmem:[%s4898_s6 + $0xc0] sm:$0xff] }
 0x2eb   : > { %v2419_v31 = vadd.f32 %v2418_v54, %v2395_v4  ;;  %v2431_v15 = vsel %vm2430_vm3, %v2864_v2, %v2429_v9 }
 0x2ed   : > { %v2420_v32 = vadd.f32 %v2419_v31, %v2396_v19 }
 0x2ef   : > { %v2421_v18 = vadd.f32 %v2420_v32, %v2397_v36  ;;  %v4142_v3 = vpop.permute.xlu1 %1457 }
 0x2f1   : > { %2731 = vmatmul.msk.f32.gmra.mxu2 %vm1555_vm2, %v1384_v23  ;;  %2742 = vmatmul.msk.f32.gmra.mxu3 %vm1555_vm2, %v1395_v6  ;;  %v2422_v28 = vadd.f32 %v2421_v18, %v2398_v33  ;;  %v1388_v23 = vld [vmem:[%s4898_s6 + $0x40] sm:$0xff]  ;;  %v1399_v6 = vld [vmem:[%s4898_s6 + $0x98] sm:$0xff] }
 0x2f3   : > { %v2423_v20 = vadd.f32 %v2422_v28, %v2399_v21 }
 0x2f5   : > { %v2424_v29 = vadd.f32 %v2423_v20, %v2400_v7 }
 0x2f7   : > { %v2432_v60 = vmul.f32 %v2431_v15, %v2424_v29  ;;  %v4148_v54 = vpop.permute.xlu1 %1472 }
 0x2f9   : > { %2732 = vmatmul.msk.f32.gmra.mxu2 %vm1555_vm2, %v1385_v51  ;;  %2743 = vmatmul.msk.f32.gmra.mxu3 %vm1555_vm2, %v1396_v0  ;;  %v4140_v51 = vpop.permute.xlu0 %1452  ;;  %v1443_v0 = vpop.permute.xlu2 %1442 }
 0x2fa   : > { %2453 = vmatpush.msra.mxu2 %v2432_v60 }
 0x2ff   : > { %v1488_v31 = vpop.permute.xlu1 %1487 }
 0x301   : > { %2733 = vmatmul.msk.f32.gmra.mxu2 %vm1555_vm2, %v1386_v10  ;;  %2744 = vmatmul.msk.f32.gmra.mxu3 %vm1555_vm2, %v1397_v17  ;;  %v4144_v4 = vpop.permute.xlu0 %1447  ;;  %v4146_v2 = vpop.permute.xlu2 %1462 }
 0x309   : > { %2734 = vmatmul.msk.f32.gmra.mxu2 %vm1555_vm2, %v1387_v30  ;;  %2745 = vmatmul.msk.f32.gmra.mxu3 %vm1555_vm2, %v1398_v5  ;;  %v4150_v19 = vpop.permute.xlu0 %1467  ;;  %v4152_v24 = vpop.permute.xlu2 %1477 }
 0x311   : > { %2735 = vmatmul.msk.f32.gmra.mxu2 %vm1555_vm2, %v1388_v23  ;;  %2746 = vmatmul.msk.f32.gmra.mxu3 %vm1555_vm2, %v1399_v6  ;;  %v4154_v17 = vpop.permute.xlu0 %1482  ;;  %v1493_v18 = vpop.permute.xlu2 %1492 }
 0x319   : > { %2736 = vmatmul.msk.f32.gmra.mxu2 %vm1555_vm2, %v1389_v58  ;;  %2747 = vmatmul.msk.f32.gmra.mxu3 %vm1555_vm2, %v1400_v38  ;;  %v1498_v23 = vpop.permute.xlu0 %1497 }
 0x321   : > { %2737 = vmatmul.msk.f32.gmra.mxu2 %vm1555_vm2, %v1390_v12  ;;  %2748 = vmatmul.msk.f32.gmra.mxu3 %vm1555_vm2, %v1401_v11 }
 0x329   : > { %2749 = vmatmul.msk.f32.gmra.mxu3 %vm1555_vm2, %v1402_v8  ;;  %2777 = vmatmul.msk.f32.vlgmr.msra.gmra.mxu2 %vm2434_vm4, %v2433_v14 }
 0x331   : > { %2750 = vmatmul.msk.f32.gmra.mxu3 %vm1555_vm2, %v1403_v41 }
 0x339   : > { %2751 = vmatmul.msk.f32.gmra.mxu3 %vm1555_vm2, %v1404_v62 }
 0x354   : > { %v1652_v36 = vpop.f32.mrf.mxu2  ;;  %v1685_v39 = vpop.f32.mrf.mxu3 }
 0x355   : > { %v1653_v32 = vadd.f32 %v1652_v36, %v1433_v27  ;;  %v1686_v33 = vadd.f32 %v1685_v39, %v1488_v31 }
 0x357   : > { %v2752_v49 = vmul.f32 -1.442695, %v1653_v32  ;;  %v2763_v10 = vmul.f32 -1.442695, %v1686_v33 }
 0x359   : > { %2865 = vpow2.f32 %v2752_v49 }
 0x35a   : > { %2867 = vpow2.f32 %v2763_v10 }
 0x35c   : > { %v1655_v21 = vpop.f32.mrf.mxu2  ;;  %v1688_v9 = vpop.f32.mrf.mxu3 }
 0x35d   : > { %v1656_v28 = vadd.f32 %v1655_v21, %v1438_v40  ;;  %v1689_v7 = vadd.f32 %v1688_v9, %v1493_v18 }
 0x35f   : > { %v2866_v20 = vpop.eup %2865  ;;  %v2753_v15 = vmul.f32 -1.442695, %v1656_v28  ;;  %v2764_v5 = vmul.f32 -1.442695, %v1689_v7 }
 0x360   : > { %v2868_v29 = vpop.eup %2867  ;;  %v1802_v30 = vadd.f32 1.0, %v2866_v20 }
 0x361   : > { %v1813_v60 = vadd.f32 1.0, %v2868_v29  ;;  %2869 = vpow2.f32 %v2753_v15 }
 0x362   : > { %2871 = vrcp.f32 %v1802_v30  ;;  %vm1832_vm5 = vweird.f32 %v1802_v30  ;;  %v1836_v33 = vand.u32 2147483647, %v1802_v30 }
 0x363   : > { %2873 = vrcp.f32 %v1813_v60  ;;  %v2001_v9 = vand.u32 2147483647, %v1813_v60  ;;  %vm1997_vm7 = vweird.f32 %v1813_v60  ;;  %v2003_v7 = vand.u32 2147483648, %v1813_v60 }
 0x364   : > { %2875 = vpow2.f32 %v2764_v5  ;;  %v1658_v6 = vpop.f32.mrf.mxu2  ;;  %v1691_v58 = vpop.f32.mrf.mxu3  ;;  %vm4170_vm10 = vcmp.eq.f32.partialorder %v1836_v33, 8.507059e+37 }
 0x365   : > { %v1659_v38 = vadd.f32 %v1658_v6, %v1443_v0  ;;  %v1692_v12 = vadd.f32 %v1691_v58, %v1498_v23  ;;  %v1838_v0 = vand.u32 2147483648, %v1802_v30  ;;  %vm2002_vm12 = vcmp.eq.f32.partialorder %v2001_v9, 8.507059e+37 }
 0x366   : > { %v2004_v33 = vor.u32 1.1754944e-38, %v2003_v7 }
 0x367   : > { %v2870_v11 = vpop.eup %2869  ;;  %v2754_v8 = vmul.f32 -1.442695, %v1659_v38  ;;  %v2765_v27 = vmul.f32 -1.442695, %v1692_v12  ;;  %v1839_v12 = vor.u32 1.1754944e-38, %v1838_v0 }
 0x368   : > { %v2872_v14 = vpop.eup %2871  ;;  %v4156_v41 = vadd.f32 1.0, %v2870_v11 }
 0x369   : > { %v2874_v40 = vpop.eup %2873  ;;  %v1828_v62 = vmul.f32 %v2872_v14, %v1802_v30  ;;  %2877 = vpow2.f32 %v2754_v8  ;;  %vm1833_vm6 = vweird.f32 %v2872_v14 }
 0x36a   : > { %v2876_v31 = vpop.eup %2875  ;;  %v1993_v36 = vmul.f32 %v2874_v40, %v1813_v60  ;;  %2879 = vrcp.f32 %v4156_v41  ;;  %vm1998_vm8 = vweird.f32 %v2874_v40  ;;  %v1851_v29 = vand.u32 2147483647, %v4156_v41  ;;  %vm4166_vm9 = vmor %vm1832_vm5, %vm1833_vm6 }
 0x36b   : > { %v1829_v39 = vsub.f32 1.0, %v1828_v62  ;;  %v4159_v32 = vadd.f32 1.0, %v2876_v31  ;;  %2881 = vpow2.f32 %v2765_v27  ;;  %v1853_v5 = vand.u32 2147483648, %v4156_v41  ;;  %v1503_v27 = vpop.permute.xlu1 %1502  ;;  %vm4180_vm11 = vmor %vm1997_vm7, %vm1998_vm8 }
 0x36c   : > { %v1994_v49 = vsub.f32 1.0, %v1993_v36  ;;  %v1661_v10 = vpop.f32.mrf.mxu2  ;;  %v1694_v18 = vpop.f32.mrf.mxu3  ;;  %vm1847_vm13 = vweird.f32 %v4156_v41  ;;  %vm4189_vm14 = vcmp.eq.f32.partialorder %v1851_v29, 8.507059e+37 }
 0x36d   : > { %v1830_v21 = vmul.f32 %v2872_v14, %v1829_v39  ;;  %2883 = vrcp.f32 %v4159_v32  ;;  %v1662_v23 = vadd.f32 %v1661_v10, %v4144_v4  ;;  %v1695_v0 = vadd.f32 %v1694_v18, %v1503_v27 }
 0x36e   : > { %v1995_v28 = vmul.f32 %v2874_v40, %v1994_v49  ;;  %v1854_v10 = vor.u32 1.1754944e-38, %v1853_v5  ;;  %vm2012_vm0 = vweird.f32 %v4159_v32  ;;  %v2018_v5 = vand.u32 2147483648, %v4159_v32 }
 0x36f   : > { %v2878_v20 = vpop.eup %2877  ;;  %v1831_v15 = vadd.f32 %v2872_v14, %v1830_v21  ;;  %v2755_v31 = vmul.f32 -1.442695, %v1662_v23  ;;  %v2766_v23 = vmul.f32 -1.442695, %v1695_v0 }
 0x370   : > { %v2880_v6 = vpop.eup %2879  ;;  %v1996_v11 = vadd.f32 %v2874_v40, %v1995_v28  ;;  %v4174_v8 = vadd.f32 1.0, %v2878_v20 }
 0x371   : > { %v1835_v62 = vsel %vm4166_vm9, %v2872_v14, %v1831_v15  ;;  %v1843_v30 = vmul.f32 %v2880_v6, %v4156_v41  ;;  %v2882_v36 = vpop.eup %2881  ;;  %vm1848_vm15 = vweird.f32 %v2880_v6 }
 0x372   : > { %v2000_v39 = vsel %vm4180_vm11, %v2874_v40, %v1996_v11  ;;  %2885 = vrcp.f32 %v4174_v8  ;;  %v1840_v21 = vsel %vm4170_vm10, %v1839_v12, %v1835_v62  ;;  %v2016_v40 = vand.u32 2147483647, %v4159_v32  ;;  %vm1849_vm2 = vmor %vm1847_vm13, %vm1848_vm15 }
 0x373   : > { %v2884_v49 = vpop.eup %2883  ;;  %v1844_v14 = vsub.f32 1.0, %v1843_v30  ;;  %v2005_v9 = vsel %vm2002_vm12, %v2004_v33, %v2000_v39  ;;  %v4197_v15 = vadd.f32 1.0, %v2882_v36  ;;  %2887 = vpow2.f32 %v2755_v31  ;;  %v1508_v31 = vpop.permute.xlu2 %1507 }
 0x374   : > { %v2008_v28 = vmul.f32 %v2884_v49, %v4159_v32  ;;  %v1664_v7 = vpop.f32.mrf.mxu2  ;;  %v1697_v20 = vpop.f32.mrf.mxu3  ;;  %v4202_v58 = vmul.f32 %v1840_v21, %v3744_v22  ;;  %v4205_v38 = vmul.f32 %v2005_v9, %v3827_v53  ;;  %vm2013_vm3 = vweird.f32 %v2884_v49 }
 0x375   : > { %v1845_v18 = vmul.f32 %v2880_v6, %v1844_v14  ;;  %2889 = vrcp.f32 %v4197_v15  ;;  %v1665_v62 = vadd.f32 %v1664_v7, %v4140_v51  ;;  %vm4211_vm4 = vcmp.eq.f32.partialorder %v2016_v40, 8.507059e+37  ;;  %vm4228_vm5 = vmor %vm2012_vm0, %vm2013_vm3 }
 0x376   : > { %v2009_v29 = vsub.f32 1.0, %v2008_v28  ;;  %2891 = vpow2.f32 %v2766_v23  ;;  %v1866_v53 = vand.u32 2147483647, %v4174_v8  ;;  %v1868_v39 = vand.u32 2147483648, %v4174_v8 }
 0x377   : > { %v1846_v12 = vadd.f32 %v2880_v6, %v1845_v18  ;;  %v2756_v33 = vmul.f32 -1.442695, %v1665_v62  ;;  %v2227_v51 = vmax.f32 %v4202_v58, %v4205_v38  ;;  %v2019_v9 = vor.u32 1.1754944e-38, %v2018_v5 }
 0x378   : > { %v2886_v11 = vpop.eup %2885  ;;  %v2010_v27 = vmul.f32 %v2884_v49, %v2009_v29  ;;  %vm1862_vm7 = vweird.f32 %v4174_v8  ;;  %vm1867_vm8 = vcmp.eq.f32.partialorder %v1866_v53, 8.507059e+37  ;;  %v1869_v5 = vor.u32 1.1754944e-38, %v1868_v39 }
 0x379   : > { %v1850_v4 = vsel %vm1849_vm2, %v2880_v6, %v1846_v12  ;;  %v1858_v22 = vmul.f32 %v2886_v11, %v4174_v8  ;;  %v2888_v0 = vpop.eup %2887  ;;  %2893 = vpow2.f32 %v2756_v33  ;;  %vm1863_vm6 = vweird.f32 %v2886_v11  ;;  %v1513_v33 = vpop.permute.xlu0 %1512 }
 0x37a   : > { %v1855_v36 = vsel %vm4189_vm14, %v1854_v10, %v1850_v4  ;;  %v2011_v41 = vadd.f32 %v2884_v49, %v2010_v27  ;;  %v1698_v10 = vadd.f32 %v1697_v20, %v1508_v31  ;;  %v4234_v28 = vadd.f32 1.0, %v2888_v0  ;;  %vm1864_vm9 = vmor %vm1862_vm7, %vm1863_vm6 }
 0x37b   : > { %v4223_v6 = vmul.f32 %v1855_v36, %v3862_v1  ;;  %v1859_v60 = vsub.f32 1.0, %v1858_v22  ;;  %v2890_v1 = vpop.eup %2889  ;;  %v2031_v27 = vand.u32 2147483647, %v4197_v15  ;;  %v2033_v4 = vand.u32 2147483648, %v4197_v15 }
 0x37c   : > { %v2015_v21 = vsel %vm4228_vm5, %v2884_v49, %v2011_v41  ;;  %v1667_v40 = vpop.f32.mrf.mxu2  ;;  %v1700_v7 = vpop.f32.mrf.mxu3  ;;  %v2767_v32 = vmul.f32 -1.442695, %v1698_v10  ;;  %v2023_v49 = vmul.f32 %v2890_v1, %v4197_v15  ;;  %2895 = vrcp.f32 %v4234_v28 }
 0x37d   : > { %v2228_v18 = vmax.f32 %v4223_v6, %v2227_v51  ;;  %v1860_v29 = vmul.f32 %v2886_v11, %v1859_v60  ;;  %v2892_v23 = vpop.eup %2891  ;;  %v2020_v12 = vsel %vm4211_vm4, %v2019_v9, %v2015_v21  ;;  %vm2028_vm10 = vweird.f32 %v2890_v1 }
 0x37e   : > { %v2024_v62 = vsub.f32 1.0, %v2023_v49  ;;  %v4244_v22 = vadd.f32 1.0, %v2892_v23  ;;  %2897 = vpow2.f32 %v2767_v32  ;;  %v4247_v30 = vmul.f32 %v2020_v12, %v3821_v52 }
 0x37f   : > { %v1861_v20 = vadd.f32 %v2886_v11, %v1860_v29  ;;  %v1668_v31 = vadd.f32 %v1667_v40, %v4142_v3  ;;  %v2894_v36 = vpop.eup %2893  ;;  %v1881_v39 = vand.u32 2147483647, %v4234_v28  ;;  %v1883_v52 = vand.u32 2147483648, %v4234_v28 }
 0x380   : > { %v2025_v53 = vmul.f32 %v2890_v1, %v2024_v62  ;;  %2899 = vrcp.f32 %v4244_v22  ;;  %v2229_v0 = vmax.f32 %v4247_v30, %v2228_v18  ;;  %v4257_v14 = vadd.f32 1.0, %v2894_v36 }
 0x381   : > { %v1865_v8 = vsel %vm1864_vm9, %v2886_v11, %v1861_v20  ;;  %vm2027_vm11 = vweird.f32 %v4197_v15  ;;  %v2757_v3 = vmul.f32 -1.442695, %v1668_v31  ;;  %v1701_v10 = vadd.f32 %v1700_v7, %v1513_v33 }
 0x382   : > { %v1870_v41 = vsel %vm1867_vm8, %v1869_v5, %v1865_v8  ;;  %v2896_v11 = vpop.eup %2895  ;;  %v2026_v60 = vadd.f32 %v2890_v1, %v2025_v53  ;;  %vm4262_vm12 = vmor %vm2027_vm11, %vm2028_vm10  ;;  %vm4266_vm13 = vcmp.eq.f32.partialorder %v2031_v27, 8.507059e+37  ;;  %v2034_v29 = vor.u32 1.1754944e-38, %v2033_v4 }
 0x383   : > { %v4254_v51 = vmul.f32 %v1870_v41, %v3742_v16  ;;  %v1873_v32 = vmul.f32 %v2896_v11, %v4234_v28  ;;  %v2046_v7 = vand.u32 2147483647, %v4244_v22  ;;  %v2048_v12 = vand.u32 2147483648, %v4244_v22 }
 0x384   : > { %v1670_v21 = vpop.f32.mrf.mxu2  ;;  %v1703_v9 = vpop.f32.mrf.mxu3  ;;  %v2030_v15 = vsel %vm4262_vm12, %v2890_v1, %v2026_v60  ;;  %2901 = vrcp.f32 %v4257_v14  ;;  %vm1877_vm14 = vweird.f32 %v4234_v28  ;;  %vm4277_vm15 = vcmp.eq.f32.partialorder %v1881_v39, 8.507059e+37 }
 0x385   : > { %v2230_v40 = vmax.f32 %v4254_v51, %v2229_v0  ;;  %v2898_v23 = vpop.eup %2897  ;;  %v1874_v49 = vsub.f32 1.0, %v1873_v32  ;;  %v1884_v5 = vor.u32 1.1754944e-38, %v1883_v52  ;;  %vm2042_vm0 = vweird.f32 %v4244_v22  ;;  %v1518_v39 = vpop.permute.xlu1 %1517 }
 0x386   : > { %v2900_v27 = vpop.eup %2899  ;;  %v4282_v62 = vadd.f32 1.0, %v2898_v23  ;;  %2903 = vpow2.f32 %v2757_v3  ;;  %v2768_v1 = vmul.f32 -1.442695, %v1701_v10  ;;  %v2035_v4 = vsel %vm4266_vm13, %v2034_v29, %v2030_v15 }
 0x387   : > { %v1875_v8 = vmul.f32 %v2896_v11, %v1874_v49  ;;  %vm1878_vm2 = vweird.f32 %v2896_v11  ;;  %v2038_v31 = vmul.f32 %v2900_v27, %v4244_v22  ;;  %vm4287_vm3 = vcmp.eq.f32.partialorder %v2046_v7, 8.507059e+37  ;;  %v1523_v22 = vpop.permute.xlu2 %1522 }
 0x388   : > { %v2049_v41 = vor.u32 1.1754944e-38, %v2048_v12  ;;  %v1896_v53 = vand.u32 2147483647, %v4257_v14  ;;  %2905 = vrcp.f32 %v4282_v62  ;;  %vm1892_vm4 = vweird.f32 %v4257_v14  ;;  %vm1879_vm5 = vmor %vm1877_vm14, %vm1878_vm2 }
 0x389   : > { %v1876_v33 = vadd.f32 %v2896_v11, %v1875_v8  ;;  %v2039_v0 = vsub.f32 1.0, %v2038_v31  ;;  %v1898_v52 = vand.u32 2147483648, %v4257_v14  ;;  %v4296_v3 = vmul.f32 %v2035_v4, %v3816_v48 }
 0x38a   : > { %v2902_v60 = vpop.eup %2901  ;;  %2907 = vpow2.f32 %v2768_v1  ;;  %v1671_v10 = vadd.f32 %v1670_v21, %v4146_v2  ;;  %v1704_v18 = vadd.f32 %v1703_v9, %v1518_v39  ;;  %vm2043_vm6 = vweird.f32 %v2900_v27 }
 0x38b   : > { %v1880_v32 = vsel %vm1879_vm5, %v2896_v11, %v1876_v33  ;;  %v2040_v23 = vmul.f32 %v2900_v27, %v2039_v0  ;;  %v1888_v15 = vmul.f32 %v2902_v60, %v4257_v14  ;;  %v2234_v12 = vmax.f32 %v2230_v40, %v4296_v3  ;;  %vm2044_vm8 = vmor %vm2042_vm0, %vm2043_vm6 }
 0x38c   : > { %v1673_v16 = vpop.f32.mrf.mxu2  ;;  %v1706_v29 = vpop.f32.mrf.mxu3  ;;  %v1885_v48 = vsel %vm4277_vm15, %v1884_v5, %v1880_v32  ;;  %vm4305_vm7 = vcmp.eq.f32.partialorder %v1896_v53, 8.507059e+37  ;;  %v2758_v49 = vmul.f32 -1.442695, %v1671_v10  ;;  %vm1893_vm9 = vweird.f32 %v2902_v60 }
 0x38d   : > { %v2904_v7 = vpop.eup %2903  ;;  %v4310_v2 = vmul.f32 %v1885_v48, %v3756_v35  ;;  %v2041_v21 = vadd.f32 %v2900_v27, %v2040_v23  ;;  %v1889_v11 = vsub.f32 1.0, %v1888_v15  ;;  %v2769_v40 = vmul.f32 -1.442695, %v1704_v18  ;;  %vm1894_vm11 = vmor %vm1892_vm4, %vm1893_vm9 }
 0x38e   : > { %v4312_v9 = vadd.f32 1.0, %v2904_v7  ;;  %v2906_v1 = vpop.eup %2905  ;;  %2909 = vpow2.f32 %v2758_v49  ;;  %v1674_v20 = vadd.f32 %v1673_v16, %v4150_v19  ;;  %v1899_v39 = vor.u32 1.1754944e-38, %v1898_v52 }
 0x38f   : > { %v2231_v5 = vmax.f32 %v4310_v2, %v2234_v12  ;;  %v2045_v4 = vsel %vm2044_vm8, %v2900_v27, %v2041_v21  ;;  %v1890_v8 = vmul.f32 %v2902_v60, %v1889_v11  ;;  %v2053_v35 = vmul.f32 %v2906_v1, %v4282_v62 }
 0x390   : > { %v2908_v31 = vpop.eup %2907  ;;  %v2050_v53 = vsel %vm4287_vm3, %v2049_v41, %v2045_v4  ;;  %v2061_v33 = vand.u32 2147483647, %v4282_v62  ;;  %2911 = vrcp.f32 %v4312_v9  ;;  %vm2057_vm10 = vweird.f32 %v4282_v62 }
 0x391   : > { %v1891_v0 = vadd.f32 %v2902_v60, %v1890_v8  ;;  %v2054_v10 = vsub.f32 1.0, %v2053_v35  ;;  %v2063_v19 = vand.u32 2147483648, %v4282_v62  ;;  %v4328_v27 = vadd.f32 1.0, %v2908_v31 }
 0x392   : > { %2913 = vpow2.f32 %v2769_v40  ;;  %v2759_v36 = vmul.f32 -1.442695, %v1674_v20  ;;  %v1707_v41 = vadd.f32 %v1706_v29, %v1523_v22  ;;  %v4333_v16 = vmul.f32 %v2050_v53, %v3811_v46 }
 0x393   : > { %v1895_v32 = vsel %vm1894_vm11, %v2902_v60, %v1891_v0  ;;  %v2055_v23 = vmul.f32 %v2906_v1, %v2054_v10  ;;  %vm2058_vm12 = vweird.f32 %v2906_v1  ;;  %vm4337_vm13 = vcmp.eq.f32.partialorder %v2061_v33, 8.507059e+37 }
 0x394   : > { %v1676_v52 = vpop.f32.mrf.mxu2  ;;  %v4330_v18 = vpop.f32.mrf.mxu3  ;;  %v1900_v7 = vsel %vm4305_vm7, %v1899_v39, %v1895_v32  ;;  %v1911_v12 = vand.u32 2147483647, %v4312_v9  ;;  %2915 = vrcp.f32 %v4328_v27  ;;  %v2235_v29 = vmax.f32 %v2231_v5, %v4333_v16  ;;  %vm2059_vm14 = vmor %vm2057_vm10, %vm2058_vm12 }
 0x395   : > { %v2910_v15 = vpop.eup %2909  ;;  %v4345_v46 = vmul.f32 %v1900_v7, %v3768_v45  ;;  %v2056_v60 = vadd.f32 %v2906_v1, %v2055_v23  ;;  %v1913_v48 = vand.u32 2147483648, %v4312_v9  ;;  %2917 = vpow2.f32 %v2759_v36 }
 0x396   : > { %v2912_v49 = vpop.eup %2911  ;;  %v4350_v28 = vadd.f32 1.0, %v2910_v15  ;;  %v2770_v21 = vmul.f32 -1.442695, %v1707_v41  ;;  %v1677_v11 = vadd.f32 %v1676_v52, %v4148_v54  ;;  %v2064_v5 = vor.u32 1.1754944e-38, %v2063_v19 }
 0x397   : > { %v2238_v40 = vmax.f32 %v4345_v46, %v2235_v29  ;;  %v2060_v20 = vsel %vm2059_vm14, %v2906_v1, %v2056_v60  ;;  %v1903_v45 = vmul.f32 %v2912_v49, %v4312_v9  ;;  %vm1907_vm15 = vweird.f32 %v4312_v9 }
 0x398   : > { %v2914_v4 = vpop.eup %2913  ;;  %v2076_v8 = vand.u32 2147483647, %v4328_v27  ;;  %v2078_v62 = vand.u32 2147483648, %v4328_v27  ;;  %2919 = vrcp.f32 %v4350_v28  ;;  %v2065_v35 = vsel %vm4337_vm13, %v2064_v5, %v2060_v20 }
 0x399   : > { %v1904_v31 = vsub.f32 1.0, %v1903_v45  ;;  %vm4361_vm0 = vcmp.eq.f32.partialorder %v1911_v12, 8.507059e+37  ;;  %v1914_v1 = vor.u32 1.1754944e-38, %v1913_v48  ;;  %vm2072_vm2 = vweird.f32 %v4328_v27  ;;  %v1528_v45 = vpop.permute.xlu0 %1527 }
 0x39a   : > { %v2916_v53 = vpop.eup %2915  ;;  %v4366_v39 = vadd.f32 1.0, %v2914_v4  ;;  %2921 = vpow2.f32 %v2770_v21  ;;  %v2760_v33 = vmul.f32 -1.442695, %v1677_v11  ;;  %vm1908_vm3 = vweird.f32 %v2912_v49 }
 0x39b   : > { %v1905_v10 = vmul.f32 %v2912_v49, %v1904_v31  ;;  %v2068_v19 = vmul.f32 %v2916_v53, %v4328_v27  ;;  %v1926_v36 = vand.u32 2147483647, %v4350_v28  ;;  %v2918_v41 = vpop.eup %2917  ;;  %v4373_v52 = vmul.f32 %v2065_v35, %v3808_v43  ;;  %vm1909_vm6 = vmor %vm1907_vm15, %vm1908_vm3 }
 0x39c   : > { %v1679_v22 = vpop.f32.mrf.mxu2  ;;  %v4368_v0 = vpop.f32.mrf.mxu3  ;;  %vm4375_vm4 = vcmp.eq.f32.partialorder %v2076_v8, 8.507059e+37  ;;  %v2079_v23 = vor.u32 1.1754944e-38, %v2078_v62  ;;  %2923 = vrcp.f32 %v4366_v39  ;;  %vm1922_vm5 = vweird.f32 %v4350_v28 }
 0x39d   : > { %v1906_v15 = vadd.f32 %v2912_v49, %v1905_v10  ;;  %v2069_v7 = vsub.f32 1.0, %v2068_v19  ;;  %v1928_v14 = vand.u32 2147483648, %v4350_v28  ;;  %v2242_v29 = vmax.f32 %v2238_v40, %v4373_v52 }
 0x39e   : > { %v2920_v12 = vpop.eup %2919  ;;  %vm2073_vm7 = vweird.f32 %v2916_v53  ;;  %v4385_v43 = vadd.f32 1.0, %v2918_v41  ;;  %2925 = vpow2.f32 %v2760_v33  ;;  %vm4388_vm8 = vcmp.eq.f32.partialorder %v1926_v36, 8.507059e+37 }
 0x39f   : > { %v1910_v60 = vsel %vm1909_vm6, %v2912_v49, %v1906_v15  ;;  %v2070_v48 = vmul.f32 %v2916_v53, %v2069_v7  ;;  %v1918_v21 = vmul.f32 %v2920_v12, %v4350_v28  ;;  %v2091_v40 = vand.u32 2147483647, %v4366_v39  ;;  %vm2074_vm9 = vmor %vm2072_vm2, %vm2073_vm7 }
 0x3a0   : > { %v2922_v20 = vpop.eup %2921  ;;  %v1915_v5 = vsel %vm4361_vm0, %v1914_v1, %v1910_v60  ;;  %v2093_v9 = vand.u32 2147483648, %v4366_v39  ;;  %2927 = vrcp.f32 %v4385_v43  ;;  %v1929_v62 = vor.u32 1.1754944e-38, %v1928_v14 }
 0x3a1   : > { %v4398_v49 = vmul.f32 %v1915_v5, %v3778_v55  ;;  %v2071_v4 = vadd.f32 %v2916_v53, %v2070_v48  ;;  %v1919_v8 = vsub.f32 1.0, %v1918_v21  ;;  %vm1923_vm10 = vweird.f32 %v2920_v12 }
 0x3a2   : > { %v2924_v35 = vpop.eup %2923  ;;  %vm2087_vm11 = vweird.f32 %v4366_v39  ;;  %v4404_v31 = vadd.f32 1.0, %v2922_v20  ;;  %v1710_v54 = vadd.f32 %v4330_v18, %v1528_v45  ;;  %vm4413_vm12 = vcmp.eq.f32.partialorder %v2091_v40, 8.507059e+37  ;;  %vm1924_vm13 = vmor %vm1922_vm5, %vm1923_vm10 }
 0x3a3   : > { %v2232_v55 = vmax.f32 %v4398_v49, %v2242_v29  ;;  %v2075_v10 = vsel %vm2074_vm9, %v2916_v53, %v2071_v4  ;;  %v1920_v19 = vmul.f32 %v2920_v12, %v1919_v8  ;;  %v2083_v36 = vmul.f32 %v2924_v35, %v4366_v39 }
 0x3a4   : > { %v4407_v1 = vpop.f32.mrf.mxu2  ;;  %v1715_v33 = vpop.f32.mrf.mxu3  ;;  %v2080_v27 = vsel %vm4375_vm4, %v2079_v23, %v2075_v10  ;;  %v2094_v7 = vor.u32 1.1754944e-38, %v2093_v9  ;;  %v1680_v18 = vadd.f32 %v1679_v22, %v4152_v24  ;;  %v1941_v48 = vand.u32 2147483647, %v4385_v43 }
 0x3a5   : > { %v2926_v41 = vpop.eup %2925  ;;  %v1921_v14 = vadd.f32 %v2920_v12, %v1920_v19  ;;  %v2084_v60 = vsub.f32 1.0, %v2083_v36  ;;  %2929 = vrcp.f32 %v4404_v31  ;;  %v4421_v29 = vmul.f32 %v2080_v27, %v3829_v56 }
 0x3a6   : > { %v2928_v53 = vpop.eup %2927  ;;  %v1943_v32 = vand.u32 2147483648, %v4385_v43  ;;  %v4427_v23 = vadd.f32 1.0, %v2926_v41  ;;  %v2771_v21 = vmul.f32 -1.442695, %v1710_v54  ;;  %vm2088_vm14 = vweird.f32 %v2924_v35  ;;  %v1533_v41 = vpop.permute.xlu1 %1532 }
 0x3a7   : > { %v1925_v24 = vsel %vm1924_vm13, %v2920_v12, %v1921_v14  ;;  %v2085_v22 = vmul.f32 %v2924_v35, %v2084_v60  ;;  %v1933_v20 = vmul.f32 %v2928_v53, %v4385_v43  ;;  %v2236_v5 = vmax.f32 %v2232_v55, %v4421_v29  ;;  %vm2089_vm15 = vmor %vm2087_vm11, %vm2088_vm14 }
 0x3a8   : > { %v1930_v56 = vsel %vm4388_vm8, %v1929_v62, %v1925_v24  ;;  %v2106_v40 = vand.u32 2147483647, %v4404_v31  ;;  %v2108_v28 = vand.u32 2147483648, %v4404_v31  ;;  %2931 = vrcp.f32 %v4427_v23 }
 0x3a9   : > { %v4436_v9 = vmul.f32 %v1930_v56, %v3787_v63  ;;  %v2086_v45 = vadd.f32 %v2924_v35, %v2085_v22  ;;  %v1934_v4 = vsub.f32 1.0, %v1933_v20  ;;  %vm1937_vm0 = vweird.f32 %v4385_v43 }
 0x3aa   : > { %vm1938_vm2 = vweird.f32 %v2928_v53  ;;  %vm4442_vm3 = vcmp.eq.f32.partialorder %v1941_v48, 8.507059e+37  ;;  %2933 = vpow2.f32 %v2771_v21  ;;  %v2761_v55 = vmul.f32 -1.442695, %v1680_v18 }
 0x3ab   : > { %v2930_v8 = vpop.eup %2929  ;;  %v2239_v63 = vmax.f32 %v4436_v9, %v2236_v5  ;;  %v2090_v62 = vsel %vm2089_vm15, %v2924_v35, %v2086_v45  ;;  %v1935_v54 = vmul.f32 %v2928_v53, %v1934_v4  ;;  %v1944_v39 = vor.u32 1.1754944e-38, %v1943_v32  ;;  %v1538_v35 = vpop.permute.xlu2 %1537  ;;  %vm1939_vm6 = vmor %vm1937_vm0, %vm1938_vm2 }
 0x3ac   : > { %v1718_v11 = vpop.f32.mrf.mxu3  ;;  %v2095_v10 = vsel %vm4413_vm12, %v2094_v7, %v2090_v62  ;;  %v2098_v19 = vmul.f32 %v2930_v8, %v4404_v31  ;;  %vm2102_vm4 = vweird.f32 %v4404_v31  ;;  %v2455_v36 = vpop.f32.mrf.mxu2  ;;  %vm4451_vm5 = vcmp.eq.f32.partialorder %v2106_v40, 8.507059e+37 }
 0x3ad   : > { %v1936_v27 = vadd.f32 %v2928_v53, %v1935_v54  ;;  %v2109_v60 = vor.u32 1.1754944e-38, %v2108_v28  ;;  %2935 = vpow2.f32 %v2761_v55  ;;  %v4456_v18 = vmul.f32 %v2095_v10, %v3846_v59  ;;  %v1543_v5 = vpop.permute.xlu0 %1542 }
 0x3ae   : > { %v2099_v15 = vsub.f32 1.0, %v2098_v19  ;;  %vm2103_vm7 = vweird.f32 %v2930_v8  ;;  %v1713_v7 = vadd.f32 %v4368_v0, %v1533_v41  ;;  %v2932_v48 = vpop.eup %2931  ;;  %v1683_v21 = vadd.f32 %v4407_v1, %v4154_v17  ;;  %v1548_v41 = vpop.permute.xlu1 %1547 }
 0x3af   : > { %v1940_v32 = vsel %vm1939_vm6, %v2928_v53, %v1936_v27  ;;  %v1716_v24 = vadd.f32 %v1715_v33, %v1538_v35  ;;  %v2458_v22 = vmax.f32 %v2455_v36, 0.0  ;;  %v2243_v59 = vmax.f32 %v2239_v63, %v4456_v18  ;;  %vm2104_vm8 = vmor %vm2102_vm4, %vm2103_vm7 }
 0x3b0   : > { %v2934_v20 = vpop.eup %2933  ;;  %v1945_v56 = vsel %vm4442_vm3, %v1944_v39, %v1940_v32  ;;  %v2100_v43 = vmul.f32 %v2930_v8, %v2099_v15  ;;  %v1948_v40 = vmul.f32 %v2932_v48, %v4427_v23  ;;  %v2772_v53 = vmul.f32 -1.442695, %v1713_v7 }
 0x3b1   : > { %v4469_v28 = vmul.f32 %v1945_v56, %v3797_v61  ;;  %v4471_v0 = vadd.f32 1.0, %v2934_v20  ;;  %v1719_v45 = vadd.f32 %v1718_v11, %v1543_v5  ;;  %2778 = vmatpush.msk.msrb.mxu2 %vm1631_vm1, %v2458_v22  ;;  %v1956_v33 = vand.u32 2147483647, %v4427_v23  ;;  %v2459_v11 = vld [vmem:[%s4901_s9] sm:$0xff] }
 0x3b2   : > { %v2101_v17 = vadd.f32 %v2930_v8, %v2100_v43  ;;  %v1949_v1 = vsub.f32 1.0, %v1948_v40  ;;  %v1958_v4 = vand.u32 2147483648, %v4427_v23  ;;  %vm1953_vm9 = vweird.f32 %v2932_v48 }
 0x3b3   : > { %v2936_v63 = vpop.eup %2935  ;;  %v2233_v62 = vmax.f32 %v4469_v28, %v2243_v59  ;;  %2937 = vrcp.f32 %v4471_v0  ;;  %v2762_v61 = vmul.f32 -1.442695, %v1683_v21  ;;  %v2773_v39 = vmul.f32 -1.442695, %v1716_v24  ;;  %v1553_v7 = vpop.permute.xlu2 %1552 }
 0x3b4   : > { %v1721_v12 = vpop.f32.mrf.mxu3  ;;  %v2105_v54 = vsel %vm2104_vm8, %v2930_v8, %v2101_v17  ;;  %v1950_v55 = vmul.f32 %v2932_v48, %v1949_v1  ;;  %v4484_v10 = vadd.f32 1.0, %v2936_v63  ;;  %2939 = vpow2.f32 %v2772_v53 }
 0x3b5   : > { %v2110_v19 = vsel %vm4451_vm5, %v2109_v60, %v2105_v54  ;;  %v2774_v36 = vmul.f32 -1.442695, %v1719_v45  ;;  %vm2460_vm1 = vcmask 31744   ;;  %vm1952_vm10 = vweird.f32 %v4427_v23 }
 0x3b6   : > { %v1951_v31 = vadd.f32 %v2932_v48, %v1950_v55  ;;  %2941 = vrcp.f32 %v4484_v10  ;;  %2779 = vmatmul.msk.f32.vlgmr.msrb.gmra.mxu2 %vm2460_vm1, %v2459_v11  ;;  %vm1954_vm11 = vmor %vm1952_vm10, %vm1953_vm9  ;;  %vm1957_vm12 = vcmp.eq.f32.partialorder %v1956_v33, 8.507059e+37  ;;  %v1959_v8 = vor.u32 1.1754944e-38, %v1958_v4 }
 0x3b7   : > { %2943 = vpow2.f32 %v2762_v61  ;;  %v4492_v27 = vmul.f32 %v2110_v19, %v3919_v50  ;;  %v1722_v60 = vadd.f32 %v1721_v12, %v1548_v41  ;;  %v2123_v56 = vand.u32 2147483648, %v4471_v0 }
 0x3b8   : > { %v1955_v14 = vsel %vm1954_vm11, %v2932_v48, %v1951_v31  ;;  %2945 = vpow2.f32 %v2773_v39  ;;  %v2121_v17 = vand.u32 2147483647, %v4471_v0  ;;  %vm2117_vm14 = vweird.f32 %v4471_v0 }
 0x3b9   : > { %v2938_v35 = vpop.eup %2937  ;;  %v1960_v15 = vsel %vm1957_vm12, %v1959_v8, %v1955_v14  ;;  %2947 = vpow2.f32 %v2774_v36  ;;  %v2237_v23 = vmax.f32 %v2233_v62, %v4492_v27  ;;  %v2775_v24 = vmul.f32 -1.442695, %v1722_v60 }
 0x3ba   : > { %v4496_v32 = vmul.f32 %v1960_v15, %v3803_v13  ;;  %v2113_v21 = vmul.f32 %v2938_v35, %v4471_v0  ;;  %v2940_v20 = vpop.eup %2939  ;;  %vm2118_vm13 = vweird.f32 %v2938_v35  ;;  %v2124_v61 = vor.u32 1.1754944e-38, %v2123_v56 }
 0x3bb   : > { %v4501_v43 = vadd.f32 1.0, %v2940_v20  ;;  %2949 = vpow2.f32 %v2775_v24  ;;  %v1973_v11 = vand.u32 2147483648, %v4484_v10  ;;  %vm2119_vm15 = vmor %vm2117_vm14, %vm2118_vm13  ;;  %v1971_v55 = vand.u32 2147483647, %v4484_v10 }
 0x3bc   : > { %v1724_v22 = vpop.f32.mrf.mxu3  ;;  %v2942_v50 = vpop.eup %2941  ;;  %v2240_v48 = vmax.f32 %v4496_v32, %v2237_v23  ;;  %v2114_v59 = vsub.f32 1.0, %v2113_v21  ;;  %vm2122_vm2 = vcmp.eq.f32.partialorder %v2121_v17, 8.507059e+37  ;;  %vm1967_vm3 = vweird.f32 %v4484_v10 }
 0x3bd   : > { %v1725_v5 = vadd.f32 %v1724_v22, %v1553_v7  ;;  %v2944_v40 = vpop.eup %2943  ;;  %v1963_v53 = vmul.f32 %v2942_v50, %v4484_v10  ;;  %2951 = vrcp.f32 %v4501_v43  ;;  %vm1968_vm0 = vweird.f32 %v2942_v50 }
 0x3be   : > { %v2946_v13 = vpop.eup %2945  ;;  %v2115_v45 = vmul.f32 %v2938_v35, %v2114_v59  ;;  %v4506_v4 = vadd.f32 1.0, %v2944_v40  ;;  %vm1969_vm4 = vmor %vm1967_vm3, %vm1968_vm0  ;;  %v1974_v8 = vor.u32 1.1754944e-38, %v1973_v11  ;;  %v2136_v14 = vand.u32 2147483647, %v4501_v43 }
 0x3bf   : > { %v2948_v1 = vpop.eup %2947  ;;  %v1964_v33 = vsub.f32 1.0, %v1963_v53  ;;  %v4508_v12 = vadd.f32 1.0, %v2946_v13  ;;  %v2776_v63 = vmul.f32 -1.442695, %v1725_v5  ;;  %vm1972_vm5 = vcmp.eq.f32.partialorder %v1971_v55, 8.507059e+37 }
 0x3c0   : > { %v2116_v62 = vadd.f32 %v2938_v35, %v2115_v45  ;;  %2953 = vrcp.f32 %v4506_v4  ;;  %v4515_v19 = vadd.f32 1.0, %v2948_v1  ;;  %v2138_v22 = vand.u32 2147483648, %v4501_v43 }
 0x3c1   : > { %v1965_v54 = vmul.f32 %v2942_v50, %v1964_v33  ;;  %2955 = vrcp.f32 %v4508_v12  ;;  %v2950_v36 = vpop.eup %2949  ;;  %vm2132_vm6 = vweird.f32 %v4501_v43  ;;  %vm4532_vm7 = vcmp.eq.f32.partialorder %v2136_v14, 8.507059e+37 }
 0x3c2   : > { %v2120_v39 = vsel %vm2119_vm15, %v2938_v35, %v2116_v62  ;;  %2957 = vpow2.f32 %v2776_v63  ;;  %v1986_v53 = vand.u32 2147483647, %v4506_v4  ;;  %v1988_v13 = vand.u32 2147483648, %v4506_v4 }
 0x3c3   : > { %v2125_v31 = vsel %vm2122_vm2, %v2124_v61, %v2120_v39  ;;  %v1966_v41 = vadd.f32 %v2942_v50, %v1965_v54  ;;  %v2952_v0 = vpop.eup %2951  ;;  %2959 = vrcp.f32 %v4515_v19  ;;  %v2139_v17 = vor.u32 1.1754944e-38, %v2138_v22 }
 0x3c4   : > { %v4520_v60 = vmul.f32 %v2125_v31, %v3915_v42  ;;  %v2128_v15 = vmul.f32 %v2952_v0, %v4501_v43  ;;  %vm2133_vm8 = vweird.f32 %v2952_v0  ;;  %vm1982_vm9 = vweird.f32 %v4506_v4 }
 0x3c5   : > { %v1970_v35 = vsel %vm1969_vm4, %v2942_v50, %v1966_v41  ;;  %v4537_v50 = vadd.f32 1.0, %v2950_v36  ;;  %vm2134_vm1 = vmor %vm2132_vm6, %vm2133_vm8  ;;  %vm2147_vm11 = vweird.f32 %v4508_v12  ;;  %v2151_v54 = vand.u32 2147483647, %v4508_v12 }
 0x3c6   : > { %v1975_v7 = vsel %vm1972_vm5, %v1974_v8, %v1970_v35  ;;  %v2954_v23 = vpop.eup %2953  ;;  %v2244_v21 = vmax.f32 %v2240_v48, %v4520_v60  ;;  %v2129_v24 = vsub.f32 1.0, %v2128_v15  ;;  %vm1987_vm12 = vcmp.eq.f32.partialorder %v1986_v53, 8.507059e+37 }
 0x3c7   : > { %v4526_v10 = vmul.f32 %v1975_v7, %v3837_v25  ;;  %v4529_v20 = vpop.eup %2955  ;;  %v1978_v5 = vmul.f32 %v2954_v23, %v4506_v4  ;;  %2961 = vrcp.f32 %v4537_v50  ;;  %vm1983_vm10 = vweird.f32 %v2954_v23 }
 0x3c8   : > { %v2958_v59 = vpop.eup %2957  ;;  %v2130_v25 = vmul.f32 %v2952_v0, %v2129_v24  ;;  %v2143_v56 = vmul.f32 %v4529_v20, %v4508_v12  ;;  %v1989_v43 = vor.u32 1.1754944e-38, %v1988_v13  ;;  %vm1984_vm13 = vmor %vm1982_vm9, %vm1983_vm10  ;;  %vm2148_vm14 = vweird.f32 %v4529_v20 }
 0x3c9   : > { %v2241_v48 = vmax.f32 %v4526_v10, %v2244_v21  ;;  %v1979_v40 = vsub.f32 1.0, %v1978_v5  ;;  %v2960_v33 = vpop.eup %2959  ;;  %v4549_v62 = vadd.f32 1.0, %v2958_v59  ;;  %v2153_v35 = vand.u32 2147483648, %v4508_v12  ;;  %vm4573_vm0 = vmor %vm2147_vm11, %vm2148_vm14 }
 0x3ca   : > { %v2131_v45 = vadd.f32 %v2952_v0, %v2130_v25  ;;  %v2144_v1 = vsub.f32 1.0, %v2143_v56  ;;  %v2158_v55 = vmul.f32 %v2960_v33, %v4515_v19  ;;  %v2166_v15 = vand.u32 2147483647, %v4515_v19 }
 0x3cb   : > { %v1980_v63 = vmul.f32 %v2954_v23, %v1979_v40  ;;  %2963 = vrcp.f32 %v4549_v62  ;;  %vm2163_vm15 = vweird.f32 %v2960_v33  ;;  %v2168_v4 = vand.u32 2147483648, %v4515_v19 }
 0x3cc   : > { %v2135_v61 = vsel %vm2134_vm1, %v2952_v0, %v2131_v45  ;;  %v2145_v11 = vmul.f32 %v4529_v20, %v2144_v1  ;;  %v2159_v41 = vsub.f32 1.0, %v2158_v55  ;;  %vm2152_vm2 = vcmp.eq.f32.partialorder %v2151_v54, 8.507059e+37 }
 0x3cd   : > { %v2140_v39 = vsel %vm4532_vm7, %v2139_v17, %v2135_v61  ;;  %v1981_v36 = vadd.f32 %v2954_v23, %v1980_v63  ;;  %v2962_v0 = vpop.eup %2961  ;;  %vm2162_vm3 = vweird.f32 %v4515_v19  ;;  %v2181_v12 = vand.u32 2147483647, %v4537_v50 }
 0x3ce   : > { %v2146_v31 = vadd.f32 %v4529_v20, %v2145_v11  ;;  %v4562_v8 = vmul.f32 %v2140_v39, %v3912_v47  ;;  %v2160_v21 = vmul.f32 %v2960_v33, %v2159_v41  ;;  %vm2164_vm4 = vmor %vm2162_vm3, %vm2163_vm15  ;;  %vm2167_vm5 = vcmp.eq.f32.partialorder %v2166_v15, 8.507059e+37 }
 0x3cf   : > { %v1985_v14 = vsel %vm1984_vm13, %v2954_v23, %v1981_v36  ;;  %v2173_v23 = vmul.f32 %v2962_v0, %v4537_v50  ;;  %v2169_v40 = vor.u32 1.1754944e-38, %v2168_v4  ;;  %v2183_v53 = vand.u32 2147483648, %v4537_v50 }
 0x3d0   : > { %v1990_v7 = vsel %vm1987_vm12, %v1989_v43, %v1985_v14  ;;  %v2245_v24 = vmax.f32 %v2241_v48, %v4562_v8  ;;  %v2150_v42 = vsel %vm4573_vm0, %v4529_v20, %v2146_v31  ;;  %v2161_v5 = vadd.f32 %v2960_v33, %v2160_v21 }
 0x3d1   : > { %v4569_v22 = vmul.f32 %v1990_v7, %v3833_v57  ;;  %v2154_v57 = vor.u32 1.1754944e-38, %v2153_v35  ;;  %v2174_v48 = vsub.f32 1.0, %v2173_v23  ;;  %v2964_v25 = vpop.eup %2963  ;;  %vm2178_vm6 = vweird.f32 %v2962_v0 }
 0x3d2   : > { %v2165_v56 = vsel %vm2164_vm4, %v2960_v33, %v2161_v5  ;;  %v2188_v20 = vmul.f32 %v2964_v25, %v4549_v62  ;;  %vm2177_vm7 = vweird.f32 %v4537_v50  ;;  %vm2182_vm8 = vcmp.eq.f32.partialorder %v2181_v12, 8.507059e+37 }
 0x3d3   : > { %v2246_v59 = vmax.f32 %v4569_v22, %v2245_v24  ;;  %v2155_v13 = vsel %vm2152_vm2, %v2154_v57, %v2150_v42  ;;  %v2175_v45 = vmul.f32 %v2962_v0, %v2174_v48  ;;  %v2170_v17 = vsel %vm2167_vm5, %v2169_v40, %v2165_v56  ;;  %vm2179_vm9 = vmor %vm2177_vm7, %vm2178_vm6 }
 0x3d4   : > { %v2189_v1 = vsub.f32 1.0, %v2188_v20  ;;  %v4588_v63 = vmul.f32 %v2155_v13, %v3905_v44  ;;  %v2184_v33 = vor.u32 1.1754944e-38, %v2183_v53  ;;  %v2196_v61 = vand.u32 2147483647, %v4549_v62 }
 0x3d5   : > { %v2176_v19 = vadd.f32 %v2962_v0, %v2175_v45  ;;  %v2198_v11 = vand.u32 2147483648, %v4549_v62  ;;  %v4593_v54 = vmul.f32 %v2170_v17, %v3901_v26  ;;  %vm2193_vm1 = vweird.f32 %v2964_v25 }
 0x3d6   : > { %v2190_v39 = vmul.f32 %v2964_v25, %v2189_v1  ;;  %v2249_v50 = vmax.f32 %v4588_v63, %v2246_v59  ;;  %vm2192_vm10 = vweird.f32 %v4549_v62  ;;  %vm2197_vm12 = vcmp.eq.f32.partialorder %v2196_v61, 8.507059e+37 }
 0x3d7   : > { %v2180_v55 = vsel %vm2179_vm9, %v2962_v0, %v2176_v19  ;;  %vm2194_vm11 = vmor %vm2192_vm10, %vm2193_vm1  ;;  %v2199_v31 = vor.u32 1.1754944e-38, %v2198_v11 }
 0x3d8   : > { %v2185_v36 = vsel %vm2182_vm8, %v2184_v33, %v2180_v55  ;;  %v2191_v44 = vadd.f32 %v2964_v25, %v2190_v39  ;;  %v2247_v41 = vmax.f32 %v4593_v54, %v2249_v50 }
 0x3d9   : > { %v4597_v43 = vmul.f32 %v2185_v36, %v3897_v34 }
 0x3da   : > { %v2195_v14 = vsel %vm2194_vm11, %v2964_v25, %v2191_v44 }
 0x3db   : > { %v2200_v26 = vsel %vm2197_vm12, %v2199_v31, %v2195_v14  ;;  %v2248_v0 = vmax.f32 %v2247_v41, %v4597_v43 }
 0x3dc   : > { %v4603_v35 = vmul.f32 %v2200_v26, %v3894_v37 }
 0x3de   : > { %v4606_v15 = vmax.f32 %v2248_v0, %v4603_v35 }
 0x3e0   : > { %v2251_v34 = vsub.f32 %v4202_v58, %v4606_v15  ;;  %v2252_v62 = vsub.f32 %v4223_v6, %v4606_v15  ;;  %v2253_v7 = vsub.f32 %v4254_v51, %v4606_v15  ;;  %v2254_v21 = vsub.f32 %v4310_v2, %v4606_v15 }
 0x3e1   : > { %v2255_v4 = vsub.f32 %v4345_v46, %v4606_v15  ;;  %v2256_v37 = vsub.f32 %v4398_v49, %v4606_v15  ;;  %v2257_v24 = vsub.f32 %v4436_v9, %v4606_v15  ;;  %v2258_v58 = vsub.f32 %v4469_v28, %v4606_v15 }
 0x3e2   : > { %v2259_v6 = vsub.f32 %v4496_v32, %v4606_v15  ;;  %v2260_v51 = vsub.f32 %v4526_v10, %v4606_v15  ;;  %v2261_v2 = vsub.f32 %v4569_v22, %v4606_v15  ;;  %v2264_v46 = vsub.f32 %v4296_v3, %v4606_v15 }
 0x3e3   : > { %v2276_v47 = vmul.f32 1.442695, %v2251_v34  ;;  %v2278_v49 = vmul.f32 1.442695, %v2252_v62  ;;  %v2280_v23 = vmul.f32 1.442695, %v2253_v7  ;;  %v2262_v40 = vsub.f32 %v4205_v38, %v4606_v15 }
 0x3e4   : > { %v2282_v9 = vmul.f32 1.442695, %v2254_v21  ;;  %v2284_v28 = vmul.f32 1.442695, %v2255_v4  ;;  %v2286_v42 = vmul.f32 1.442695, %v2256_v37  ;;  %v2263_v20 = vsub.f32 %v4247_v30, %v4606_v15 }
 0x3e5   : > { %2965 = vpow2.f32 %v2276_v47  ;;  %v2288_v10 = vmul.f32 1.442695, %v2257_v24  ;;  %v2290_v59 = vmul.f32 1.442695, %v2258_v58  ;;  %v2292_v12 = vmul.f32 1.442695, %v2259_v6 }
 0x3e6   : > { %2967 = vpow2.f32 %v2278_v49  ;;  %v2294_v53 = vmul.f32 1.442695, %v2260_v51  ;;  %v2296_v17 = vmul.f32 1.442695, %v2261_v2  ;;  %v2298_v33 = vmul.f32 1.442695, %v2262_v40 }
 0x3e7   : > { %2969 = vpow2.f32 %v2280_v23  ;;  %v2265_v11 = vsub.f32 %v4333_v16, %v4606_v15  ;;  %v2300_v55 = vmul.f32 1.442695, %v2263_v20  ;;  %v2266_v36 = vsub.f32 %v4373_v52, %v4606_v15 }
 0x3e8   : > { %2971 = vpow2.f32 %v2282_v9  ;;  %v2302_v50 = vmul.f32 1.442695, %v2264_v46  ;;  %v2267_v41 = vsub.f32 %v4421_v29, %v4606_v15  ;;  %v2268_v0 = vsub.f32 %v4456_v18, %v4606_v15 }
 0x3e9   : > { %2973 = vpow2.f32 %v2284_v28  ;;  %v2304_v16 = vmul.f32 1.442695, %v2265_v11  ;;  %v2306_v52 = vmul.f32 1.442695, %v2266_v36  ;;  %v2269_v7 = vsub.f32 %v4492_v27, %v4606_v15 }
 0x3ea   : > { %2975 = vpow2.f32 %v2286_v42  ;;  %v2308_v29 = vmul.f32 1.442695, %v2267_v41  ;;  %v2270_v37 = vsub.f32 %v4520_v60, %v4606_v15  ;;  %v2310_v18 = vmul.f32 1.442695, %v2268_v0 }
 0x3eb   : > { %v4632_v32 = vpop.eup %2965  ;;  %2977 = vpow2.f32 %v2288_v10  ;;  %v2271_v6 = vsub.f32 %v4562_v8, %v4606_v15  ;;  %v2312_v51 = vmul.f32 1.442695, %v2269_v7  ;;  %v2272_v46 = vsub.f32 %v4588_v63, %v4606_v15 }
 0x3ec   : > { %v4634_v5 = vpop.eup %2967  ;;  %2979 = vpow2.f32 %v2290_v59  ;;  %v2314_v47 = vmul.f32 1.442695, %v2270_v37  ;;  %v2273_v60 = vsub.f32 %v4593_v54, %v4606_v15  ;;  %v2274_v8 = vsub.f32 %v4597_v43, %v4606_v15 }
 0x3ed   : > { %v2326_v22 = vadd.f32 %v4634_v5, %v4632_v32  ;;  %v4638_v3 = vpop.eup %2969  ;;  %2981 = vpow2.f32 %v2292_v12  ;;  %v2316_v9 = vmul.f32 1.442695, %v2271_v6  ;;  %v2318_v10 = vmul.f32 1.442695, %v2272_v46 }
 0x3ee   : > { %v4641_v48 = vpop.eup %2971  ;;  %2983 = vpow2.f32 %v2294_v53  ;;  %v2275_v63 = vsub.f32 %v4603_v35, %v4606_v15  ;;  %v2322_v54 = vmul.f32 1.442695, %v2274_v8 }
 0x3ef   : > { %v2327_v57 = vadd.f32 %v4638_v3, %v2326_v22  ;;  %v4644_v56 = vpop.eup %2973  ;;  %2985 = vpow2.f32 %v2296_v17 }
 0x3f0   : > { %v4649_v45 = vpop.eup %2975  ;;  %2987 = vpow2.f32 %v2298_v33 }
 0x3f1   : > { %v2328_v25 = vadd.f32 %v4641_v48, %v2327_v57  ;;  %v4654_v1 = vpop.eup %2977  ;;  %2989 = vpow2.f32 %v2300_v55  ;;  %v2320_v57 = vmul.f32 1.442695, %v2273_v60 }
 0x3f2   : > { %v4657_v38 = vpop.eup %2979  ;;  %2991 = vpow2.f32 %v2302_v50 }
 0x3f3   : > { %v2329_v13 = vadd.f32 %v4644_v56, %v2328_v25  ;;  %v4662_v30 = vpop.eup %2981  ;;  %2993 = vpow2.f32 %v2304_v16 }
 0x3f4   : > { %v4667_v31 = vpop.eup %2983  ;;  %2995 = vpow2.f32 %v2306_v52 }
 0x3f5   : > { %v2330_v19 = vadd.f32 %v4649_v45, %v2329_v13  ;;  %v4672_v26 = vpop.eup %2985  ;;  %2997 = vpow2.f32 %v2308_v29  ;;  %v2324_v13 = vmul.f32 1.442695, %v2275_v63 }
 0x3f6   : > { %v4677_v62 = vpop.eup %2987  ;;  %2999 = vpow2.f32 %v2310_v18 }
 0x3f7   : > { %v2331_v61 = vadd.f32 %v4654_v1, %v2330_v19  ;;  %v4682_v4 = vpop.eup %2989  ;;  %3001 = vpow2.f32 %v2312_v51 }
 0x3f8   : > { %v2992_v58 = vpop.eup %2991  ;;  %3003 = vpow2.f32 %v2314_v47 }
 0x3f9   : > { %v2332_v39 = vadd.f32 %v4657_v38, %v2331_v61  ;;  %v2994_v2 = vpop.eup %2993  ;;  %3005 = vpow2.f32 %v2316_v9 }
 0x3fa   : > { %v2996_v23 = vpop.eup %2995  ;;  %3007 = vpow2.f32 %v2318_v10  ;;  %v3022_v10 = vld [vmem:[%s4018_s26 + $0x8] sm:$0xff] }
 0x3fb   : > { %v2333_v44 = vadd.f32 %v4662_v30, %v2332_v39  ;;  %v2998_v42 = vpop.eup %2997  ;;  %3009 = vpow2.f32 %v2320_v57  ;;  %v3024_v57 = vld [vmem:[%s4018_s26 + $0x18] sm:$0xff] }
 0x3fc   : > { %v3000_v59 = vpop.eup %2999  ;;  %3011 = vpow2.f32 %v2322_v54 }
 0x3fd   : > { %v2334_v14 = vadd.f32 %v4667_v31, %v2333_v44  ;;  %v3002_v25 = vpop.eup %3001  ;;  %3013 = vpow2.f32 %v2324_v13  ;;  %v3027_v13 = vld [vmem:[%s4018_s26 + $0x30] sm:$0xff] }
 0x3fe   : > { %v3004_v53 = vpop.eup %3003 }
 0x3ff   : > { %v2335_v34 = vadd.f32 %v4672_v26, %v2334_v14  ;;  %v3006_v17 = vpop.eup %3005 }
 0x400   : > { %v3008_v19 = vpop.eup %3007 }
 0x401   : > { %v2336_v21 = vadd.f32 %v4677_v62, %v2335_v34  ;;  %v3010_v61 = vpop.eup %3009 }
 0x402   : > { %v3012_v35 = vpop.eup %3011 }
 0x403   : > { %v2337_v24 = vadd.f32 %v4682_v4, %v2336_v21  ;;  %v3014_v55 = vpop.eup %3013 }
 0x405   : > { %v2338_v27 = vadd.f32 %v2992_v58, %v2337_v24 }
 0x407   : > { %v2339_v49 = vadd.f32 %v2994_v2, %v2338_v27 }
 0x409   : > { %v2340_v28 = vadd.f32 %v2996_v23, %v2339_v49 }
 0x40b   : > { %v2341_v22 = vadd.f32 %v2998_v42, %v2340_v28 }
 0x40d   : > { %v2342_v12 = vadd.f32 %v3000_v59, %v2341_v22 }
 0x40f   : > { %v2343_v40 = vadd.f32 %v3002_v25, %v2342_v12 }
 0x411   : > { %v2344_v20 = vadd.f32 %v3004_v53, %v2343_v40  ;;  %v3026_v40 = vld [vmem:[%s4018_s26 + $0x28] sm:$0xff] }
 0x413   : > { %v2345_v43 = vadd.f32 %v3006_v17, %v2344_v20 }
 0x415   : > { %v2346_v33 = vadd.f32 %v3008_v19, %v2345_v43 }
 0x417   : > { %v2347_v11 = vadd.f32 %v3010_v61, %v2346_v33  ;;  %v3028_v33 = vld [vmem:[%s4018_s26 + $0x38] sm:$0xff] }
 0x419   : > { %v2348_v15 = vadd.f32 %v3012_v35, %v2347_v11 }
 0x41b   : > { %v2349_v39 = vadd.f32 %v3014_v55, %v2348_v15 }
 0x41d   : > { %3015 = vrcp.f32 %v2349_v39  ;;  %v3030_v39 = vld [vmem:[%s4018_s26 + $0x48] sm:$0xff] }
 0x423   : > { %v3016_v36 = vpop.eup %3015 }
 0x424   : > { %v2351_v50 = vmul.f32 %v3016_v36, %v4632_v32  ;;  %v2352_v44 = vmul.f32 %v3016_v36, %v4634_v5  ;;  %v2353_v41 = vmul.f32 %v3016_v36, %v4638_v3  ;;  %v2354_v16 = vmul.f32 %v3016_v36, %v4641_v48 }
 0x425   : > { %v4702_v14 = vmul.f32 %v3016_v36, %v4644_v56  ;;  %v4705_v0 = vmul.f32 %v3016_v36, %v4649_v45  ;;  %v4708_v52 = vmul.f32 %v3016_v36, %v4654_v1  ;;  %v4711_v34 = vmul.f32 %v3016_v36, %v4657_v38 }
 0x426   : > { %v4714_v32 = vmul.f32 %v3016_v36, %v4662_v30  ;;  %v4717_v5 = vmul.f32 %v3016_v36, %v4667_v31  ;;  %v4720_v3 = vmul.f32 %v3016_v36, %v4672_v26  ;;  %v4723_v48 = vmul.f32 %v3016_v36, %v4677_v62 }
 0x427   : > { %v4726_v56 = vmul.f32 %v3016_v36, %v4682_v4  ;;  %v4728_v45 = vmul.f32 %v3016_v36, %v2992_v58  ;;  %v4730_v1 = vmul.f32 %v3016_v36, %v2994_v2  ;;  %v4732_v38 = vmul.f32 %v3016_v36, %v2996_v23 }
 0x428   : > { %v4734_v30 = vmul.f32 %v3016_v36, %v2998_v42  ;;  %v4736_v7 = vmul.f32 %v3016_v36, %v3000_v59  ;;  %v4738_v31 = vmul.f32 %v3016_v36, %v3002_v25  ;;  %v4740_v26 = vmul.f32 %v3016_v36, %v3004_v53  ;;  %v3021_v42 = vld [vmem:[%s4018_s26] sm:$0xff]  ;;  %v3023_v59 = vld [vmem:[%s4018_s26 + $0x10] sm:$0xff] }
 0x429   : > { %v4742_v29 = vmul.f32 %v3016_v36, %v3006_v17  ;;  %v4744_v62 = vmul.f32 %v3016_v36, %v3008_v19  ;;  %v4746_v21 = vmul.f32 %v3016_v36, %v3010_v61  ;;  %v4748_v4 = vmul.f32 %v3016_v36, %v3012_v35  ;;  %v3025_v25 = vld [vmem:[%s4018_s26 + $0x20] sm:$0xff] }
 0x42a   : > { %v4750_v37 = vmul.f32 %v3016_v36, %v3014_v55  ;;  %v3029_v35 = vld [vmem:[%s4018_s26 + $0x40] sm:$0xff] }
 0x439   : > { %v2484_v18 = vpop.f32.mrf.mxu2 }
 0x43a   : > { %v2780_v24 = vmul.f32 -1.442695, %v2484_v18 }
 0x43c   : > { %3017 = vpow2.f32 %v2780_v24 }
 0x442   : > { %v3018_v58 = vpop.eup %3017 }
 0x443   : > { %v2490_v6 = vadd.f32 1.0, %v3018_v58  ;;  %v3033_v58 = vld [vmem:[%s4018_s26 + $0x60] sm:$0xff] }
 0x445   : > { %3019 = vrcp.f32 %v2490_v6  ;;  %v2502_v46 = vand.u32 2147483648, %v2490_v6  ;;  %v2500_v49 = vand.u32 2147483647, %v2490_v6  ;;  %vm2496_vm14 = vweird.f32 %v2490_v6 }
 0x447   : > { %v2503_v60 = vor.u32 1.1754944e-38, %v2502_v46  ;;  %vm2501_vm0 = vcmp.eq.f32.partialorder %v2500_v49, 8.507059e+37 }
 0x44b   : > { %v3020_v51 = vpop.eup %3019 }
 0x44c   : > { %v2492_v27 = vmul.f32 %v3020_v51, %v2490_v6  ;;  %vm2497_vm13 = vweird.f32 %v3020_v51 }
 0x44d   : > { %vm2498_vm15 = vmor %vm2496_vm14, %vm2497_vm13 }
 0x44e   : > { %v2493_v2 = vsub.f32 1.0, %v2492_v27 }
 0x450   : > { %v2494_v47 = vmul.f32 %v3020_v51, %v2493_v2  ;;  %v3035_v2 = vld [vmem:[%s4018_s26 + $0x70] sm:$0xff] }
 0x452   : > { %v2495_v23 = vadd.f32 %v3020_v51, %v2494_v47  ;;  %v3036_v47 = vld [vmem:[%s4018_s26 + $0x78] sm:$0xff] }
 0x454   : > { %v2499_v9 = vsel %vm2498_vm15, %v3020_v51, %v2495_v23  ;;  %v3034_v51 = vld [vmem:[%s4018_s26 + $0x68] sm:$0xff]  ;;  %v3037_v23 = vld [vmem:[%s4018_s26 + $0x80] sm:$0xff] }
 0x455   : > { %v4752_v28 = vsel %vm2501_vm0, %v2503_v60, %v2499_v9  ;;  %v3038_v9 = vld [vmem:[%s4018_s26 + $0x88] sm:$0xff] }
 0x456   : > { %v2506_v8 = vmul.f32 %v3021_v42, %v4752_v28  ;;  %v2507_v22 = vmul.f32 %v3022_v10, %v4752_v28  ;;  %v2508_v63 = vmul.f32 %v3023_v59, %v4752_v28  ;;  %v2509_v12 = vmul.f32 %v3024_v57, %v4752_v28 }
 0x457   : > { %v2510_v54 = vmul.f32 %v3025_v25, %v4752_v28  ;;  %v2511_v53 = vmul.f32 %v3026_v40, %v4752_v28  ;;  %v2512_v20 = vmul.f32 %v3027_v13, %v4752_v28  ;;  %v2513_v61 = vmul.f32 %v3028_v33, %v4752_v28 }
 0x458   : > { %v2531_v17 = vmul.f32 %v2506_v8, %v2351_v50  ;;  %v2532_v43 = vmul.f32 %v2507_v22, %v2352_v44  ;;  %v2533_v19 = vmul.f32 %v2508_v63, %v2353_v41  ;;  %v2534_v11 = vmul.f32 %v2509_v12, %v2354_v16  ;;  %v3031_v44 = vld [vmem:[%s4018_s26 + $0x50] sm:$0xff]  ;;  %v3040_v22 = vld [vmem:[%s4018_s26 + $0x98] sm:$0xff]  ;;  %v3041_v63 = vld [vmem:[%s4018_s26 + $0xa0] sm:$0xff] }
 0x459   : > { %v2514_v15 = vmul.f32 %v3029_v35, %v4752_v28  ;;  %v2535_v55 = vmul.f32 %v2510_v54, %v4702_v14  ;;  %v2515_v36 = vmul.f32 %v3030_v39, %v4752_v28  ;;  %v2536_v50 = vmul.f32 %v2511_v53, %v4705_v0  ;;  %v3032_v14 = vld [vmem:[%s4018_s26 + $0x58] sm:$0xff]  ;;  %v3039_v8 = vld [vmem:[%s4018_s26 + $0x90] sm:$0xff] }
 0x45a   : > { %2556 = vst [vmem:[%s4774_s28] sm:$0xff] %v2531_v17  ;;  %v2516_v41 = vmul.f32 %v3031_v44, %v4752_v28  ;;  %v2537_v16 = vmul.f32 %v2512_v20, %v4708_v52  ;;  %v2517_v18 = vmul.f32 %v3032_v14, %v4752_v28  ;;  %v2538_v24 = vmul.f32 %v2513_v61, %v4711_v34 }
 0x45b   : > { %2557 = vst [vmem:[%s4774_s28 + $0x8] sm:$0xff] %v2532_v43  ;;  %v2518_v0 = vmul.f32 %v3033_v58, %v4752_v28  ;;  %v2539_v6 = vmul.f32 %v2514_v15, %v4714_v32  ;;  %v2519_v52 = vmul.f32 %v3034_v51, %v4752_v28  ;;  %v2540_v27 = vmul.f32 %v2515_v36, %v4717_v5 }
 0x45c   : > { %2558 = vst [vmem:[%s4774_s28 + $0x10] sm:$0xff] %v2533_v19  ;;  %v2520_v34 = vmul.f32 %v3035_v2, %v4752_v28  ;;  %v2541_v46 = vmul.f32 %v2516_v41, %v4720_v3  ;;  %v2521_v32 = vmul.f32 %v3036_v47, %v4752_v28  ;;  %v2542_v49 = vmul.f32 %v2517_v18, %v4723_v48 }
 0x45d   : > { %2559 = vst [vmem:[%s4774_s28 + $0x18] sm:$0xff] %v2534_v11  ;;  %v2522_v5 = vmul.f32 %v3037_v23, %v4752_v28  ;;  %v2543_v60 = vmul.f32 %v2518_v0, %v4726_v56  ;;  %v2523_v3 = vmul.f32 %v3038_v9, %v4752_v28  ;;  %v2544_v42 = vmul.f32 %v2519_v52, %v4728_v45 }
 0x45e   : > { %2560 = vst [vmem:[%s4774_s28 + $0x20] sm:$0xff] %v2535_v55  ;;  %v2524_v48 = vmul.f32 %v3039_v8, %v4752_v28  ;;  %v2545_v10 = vmul.f32 %v2520_v34, %v4730_v1  ;;  %v2525_v56 = vmul.f32 %v3040_v22, %v4752_v28  ;;  %v2546_v59 = vmul.f32 %v2521_v32, %v4732_v38  ;;  %v3042_v1 = vld [vmem:[%s4018_s26 + $0xa8] sm:$0xff]  ;;  %v3043_v38 = vld [vmem:[%s4018_s26 + $0xb0] sm:$0xff] }
 0x45f   : > { %2561 = vst [vmem:[%s4774_s28 + $0x28] sm:$0xff] %v2536_v50  ;;  %v2526_v45 = vmul.f32 %v3041_v63, %v4752_v28  ;;  %v2547_v57 = vmul.f32 %v2522_v5, %v4734_v30  ;;  %v2527_v12 = vmul.f32 %v3042_v1, %v4752_v28  ;;  %v2548_v25 = vmul.f32 %v2523_v3, %v4736_v7  ;;  %v3044_v30 = vld [vmem:[%s4018_s26 + $0xb8] sm:$0xff]  ;;  %v3045_v7 = vld [vmem:[%s4018_s26 + $0xc0] sm:$0xff]  ;;  %s4951_s26 = sand.u32 1, %s3100_s14  }
 0x460   : > { %2562 = vst [vmem:[%s4774_s28 + $0x30] sm:$0xff] %v2537_v16  ;;  %v2528_v54 = vmul.f32 %v3043_v38, %v4752_v28  ;;  %v2549_v40 = vmul.f32 %v2524_v48, %v4738_v31  ;;  %v2529_v53 = vmul.f32 %v3044_v30, %v4752_v28  ;;  %v2550_v13 = vmul.f32 %v2525_v56, %v4740_v26  ;;  %s2582_s12 = scalar_lea.sflag [#allocation5], %s4951_s26 }
 0x461   : > { %2563 = vst [vmem:[%s4774_s28 + $0x38] sm:$0xff] %v2538_v24  ;;  %v2530_v20 = vmul.f32 %v3045_v7, %v4752_v28  ;;  %v2551_v31 = vmul.f32 %v2526_v45, %v4742_v29  ;;  %v2552_v17 = vmul.f32 %v2527_v12, %v4744_v62 }
 0x462   : > { %2564 = vst [vmem:[%s4774_s28 + $0x40] sm:$0xff] %v2539_v6  ;;  %v2553_v26 = vmul.f32 %v2528_v54, %v4746_v21  ;;  %v2554_v28 = vmul.f32 %v2529_v53, %v4748_v4 }
 0x463   : > { %2565 = vst [vmem:[%s4774_s28 + $0x48] sm:$0xff] %v2540_v27  ;;  %v2555_v29 = vmul.f32 %v2530_v20, %v4750_v37 }
 0x464   : > { %2566 = vst [vmem:[%s4774_s28 + $0x50] sm:$0xff] %v2541_v46 }
 0x465   : > { %2567 = vst [vmem:[%s4774_s28 + $0x58] sm:$0xff] %v2542_v49 }
 0x466   : > { %2568 = vst [vmem:[%s4774_s28 + $0x60] sm:$0xff] %v2543_v60 }
 0x467   : > { %2569 = vst [vmem:[%s4774_s28 + $0x68] sm:$0xff] %v2544_v42 }
 0x468   : > { %2570 = vst [vmem:[%s4774_s28 + $0x70] sm:$0xff] %v2545_v10 }
 0x469   : > { %2571 = vst [vmem:[%s4774_s28 + $0x78] sm:$0xff] %v2546_v59 }
 0x46a   : > { %2572 = vst [vmem:[%s4774_s28 + $0x80] sm:$0xff] %v2547_v57 }
 0x46b   : > { %2573 = vst [vmem:[%s4774_s28 + $0x88] sm:$0xff] %v2548_v25 }
 0x46c   : > { %2574 = vst [vmem:[%s4774_s28 + $0x90] sm:$0xff] %v2549_v40 }
 0x46d   : > { %2575 = vst [vmem:[%s4774_s28 + $0x98] sm:$0xff] %v2550_v13 }
 0x46e   : > { %2576 = vst [vmem:[%s4774_s28 + $0xa0] sm:$0xff] %v2551_v31 }
 0x46f   : > { %2577 = vst [vmem:[%s4774_s28 + $0xa8] sm:$0xff] %v2552_v17 }
 0x470   : > { %2578 = vst [vmem:[%s4774_s28 + $0xb0] sm:$0xff] %v2553_v26 }
 0x471   : > { %2579 = vst [vmem:[%s4774_s28 + $0xb8] sm:$0xff] %v2554_v28 }
 0x472   : > { %2580 = vst [vmem:[%s4774_s28 + $0xc0] sm:$0xff] %v2555_v29 }
 0x473   : > { %3073 = shalt.err (!%p3070_p5)
}
 0x474   : > { %s3112_s28 = smov 128   ;;  %s3113_s26 = smov 256  }
 0x475   : > { %s3114_s0 = smov 8  }
 0x476   : > { %2816 = dma.vmem_to_hbm [thread:$0]  (%p3212_p6), %s2594_s30, 3200, %s2596_s27, %s2582_s12, %s3112_s28, %s3113_s26, %s3114_s0  }
 0x477 PF: > { %s2610_s20 = sand.u32 1, %s3096_s13   ;;  %p2819_p7 = pnand %p2684_p9, %p3216_p8 }
 0x478   : > { %s2611_s18 = scalar_lea.sflag [#allocation5], %s2610_s20 }
 0x479   : > { %p2820_p10 = pneg %p2819_p7 }
 0x47b   : > { %3091 = dma.done.wait (%p2820_p10), %s2611_s18, 3200  }
 0x47c   : > { %3093 = vsyncadd (%p2820_p10), %s2611_s18, 4294964096  ;;  %p20_p11 = scmp.ge.s32.totalorder %s3193_s19, 4   ;;  %s4952_s13 = smov %s3100_s14 }
 0x47d   : > { %s4953_s14 = smov %s3104_s15  ;;  %s4954_s15 = smov %s3206_s22 }
 0x47e   : > { %s4955_s16 = smov %s3193_s19  ;;  %22 = sbr.rel (!%p20_p11) target bundleno = 5 (0x5), region = 184 }
 0x483   :  { %2617 = vsyncpa [#allocation5], 1 }
 0x484   :  { %2619 = vsyncpa [#allocation5 + $0x1], 1 }

</bundles_post_ra>
